<compile_context>
chip_gen: v5e
topology: v5e:2x2
jax: 0.10.0
libtpu: 0.0.40
codegen_flags: <defaults>
</compile_context>

<pallas_src>
import math

import numpy as np
import jax
import jax.numpy as jnp
from jax.experimental import pallas as pl
from jax.experimental.pallas import tpu as pltpu

D_MODEL = 128
NHEAD = 4
NUM_LAYERS = 2
DIM_FF = 256
HEAD_DIM = D_MODEL // NHEAD
EPS = 1e-5                          # PyTorch LayerNorm default
MATMUL_DTYPE = jnp.bfloat16         # MXU input dtype; all accumulation is f32

ALL_HEADS = NHEAD * D_MODEL         # 512 (merged per-head lane width)
VEC_LANES = ALL_HEADS               # f32 bias/norm slab lane width

# Row layout of the per-layer f32 bias/norm slab (L, VEC_ROWS, VEC_LANES):
ROW_N1W, ROW_N1B, ROW_N2W, ROW_N2B = 0, 1, 2, 3
ROW_ACONST = 4      # bv @ Wo^T + bo      (D lanes)
ROW_B2 = 5          # FFN second bias     (D lanes)
ROW_B1 = 6          # FFN first bias      (FF lanes)
ROW_SBIAS = 7       # lane-concat of (bq_h Wk_h)/sqrt(d_h) over heads (4D lanes)
VEC_ROWS = 8


def _layer_norm(x, w, b):
    mu = jnp.mean(x, axis=-1, keepdims=True)
    var = jnp.mean(jnp.square(x - mu), axis=-1, keepdims=True)
    return (x - mu) * jax.lax.rsqrt(var + EPS) * w + b


def global_agg_kernel(x_ref, wm_ref, wn_ref, w1_ref, vec_ref, pool_ref,
                      out_ref, x_sc):
    l = pl.program_id(0)
    nrows = x_sc.shape[0]           # K (static)

    @pl.when(l == 0)
    def _():
        x_sc[...] = x_ref[...]

    x = x_sc[...]                                        # (K, D) f32

    def vec(row, n):                                     # (1, n) f32, static slice
        return vec_ref[0, row:row + 1, 0:n]

    # ---------------- self-attention block (norm_first), merged heads ----------
    xn = _layer_norm(x, vec(ROW_N1W, D_MODEL), vec(ROW_N1B, D_MODEL))
    xn_b = xn.astype(MATMUL_DTYPE)

    m_all = wm_ref[0]                                    # (D, 4D) bf16
    qm = jnp.dot(xn_b, m_all, preferred_element_type=jnp.float32)   # (K, 4D)
    qm = (qm + vec(ROW_SBIAS, ALL_HEADS)).astype(MATMUL_DTYPE)

    # Per-head scores via dot_general (contract last dims of both -> no xn^T),
    # stacked along sublanes so ONE softmax covers all heads.
    s_parts = []
    for h in range(NHEAD):
        qm_h = qm[:, h * D_MODEL:(h + 1) * D_MODEL]      # 128-lane aligned slice
        s_parts.append(jax.lax.dot_general(
            qm_h, xn_b, (((1,), (1,)), ((), ())),
            preferred_element_type=jnp.float32))         # (K, K)
    s = jnp.concatenate(s_parts, axis=0)                 # (4K, K) f32
    s = s - jnp.max(s, axis=-1, keepdims=True)
    p = jnp.exp(s)
    p = p * pl.reciprocal(jnp.sum(p, axis=-1, keepdims=True), approx=True)

    # Per-head context, lane-concatenated, then ONE merged value->output dot.
    ctx_parts = [jnp.dot(p[h * nrows:(h + 1) * nrows, :], xn,
                         preferred_element_type=jnp.float32)
                 for h in range(NHEAD)]                  # 4 x (K, D) f32
    ctx = jnp.concatenate(ctx_parts, axis=-1).astype(MATMUL_DTYPE)   # (K, 4D)
    n_all = wn_ref[0, 0:ALL_HEADS, :]                    # (4D, D) bf16
    attn = jnp.dot(ctx, n_all, preferred_element_type=jnp.float32)   # (K, D)
    x = x + attn + vec(ROW_ACONST, D_MODEL)

    # ---------------- feed-forward block (norm_first, ReLU) --------------------
    xn2 = _layer_norm(x, vec(ROW_N2W, D_MODEL), vec(ROW_N2B, D_MODEL))
    w1 = w1_ref[0]                                       # (D, FF) bf16
    w2 = wn_ref[0, ALL_HEADS:, :]                        # (FF, D) bf16 (no padding)
    h1 = jnp.dot(xn2.astype(MATMUL_DTYPE), w1,
                 preferred_element_type=jnp.float32) + vec(ROW_B1, DIM_FF)
    h1 = jnp.maximum(h1, 0.0)
    h2 = jnp.dot(h1.astype(MATMUL_DTYPE), w2,
                 preferred_element_type=jnp.float32) + vec(ROW_B2, D_MODEL)
    x = x + h2

    x_sc[...] = x                                        # carry to next layer

    # ---------------- attention pooling on the last layer ----------------------
    # softmax(x @ fc_w^T) @ x   (fc bias is softmax-invariant -> dropped)
    @pl.when(l == NUM_LAYERS - 1)
    def _():
        scores = jnp.sum(x * pool_ref[...], axis=-1, keepdims=True)   # (K, 1)
        scores = scores - jnp.max(scores, axis=0, keepdims=True)
        e = jnp.exp(scores)
        alpha = e * pl.reciprocal(jnp.sum(e, axis=0, keepdims=True), approx=True)
        out_ref[...] = jnp.sum(alpha * x, axis=0, keepdims=True)      # (1, D)


def prepare_params(params):
    """Fold / transpose / pack the PyTorch-layout params ONCE (outside the per-call
    path).  Returns tightly packed per-layer slabs:
      w_m   (L, D, 4D)        bf16  lane-concat of M_h = (Wq_h^T Wk_h)/sqrt(d_h)
      w_n   (L, 4D + FF, D)   bf16  row-stack of N_h = Wv_h^T Wo_h, then W2
      w_1   (L, D, FF)        bf16  W1
      vecs  (L, VEC_ROWS, 4D) f32   norms / biases / folded constants
      pool  (1, D)            f32   attn_fc weight
    """
    L, D, H, HD, FF = NUM_LAYERS, D_MODEL, NHEAD, HEAD_DIM, DIM_FF
    hi = jax.lax.Precision.HIGHEST
    scale = 1.0 / math.sqrt(HD)

    wqkv = params["in_proj_w"].astype(jnp.float32)              # (L, 3D, D)
    bqkv = params["in_proj_b"].reshape(L, 3 * D)
    woT = jnp.transpose(params["out_proj_w"], (0, 2, 1))        # (L, D, D)
    bo = params["out_proj_b"].reshape(L, D)

    wq = wqkv[:, 0:D].reshape(L, H, HD, D)
    wk = wqkv[:, D:2 * D].reshape(L, H, HD, D)
    wv = wqkv[:, 2 * D:3 * D].reshape(L, H, HD, D)
    bq = bqkv[:, 0:D].reshape(L, H, HD)
    bv = bqkv[:, 2 * D:3 * D]
    woT_h = woT.reshape(L, H, HD, D)

    # Folded weights (f32 math at prep time; stored bf16 for the MXU).
    m = scale * jnp.einsum("lhad,lhae->lhde", wq, wk, precision=hi)    # (L,H,D,D)
    n = jnp.einsum("lhad,lhae->lhde", wv, woT_h, precision=hi)         # (L,H,D,D)
    sbias = scale * jnp.einsum("lha,lhad->lhd", bq, wk, precision=hi)  # (L,H,D)
    aconst = jnp.einsum("ld,lde->le", bv, woT, precision=hi) + bo      # (L,D)

    # M_all: lane-concat over heads -> (L, D, H*D)
    w_m = jnp.transpose(m, (0, 2, 1, 3)).reshape(L, D, H * D).astype(MATMUL_DTYPE)
    # N_all row-stacked over heads, then W2 appended (lane width D, zero padding)
    n_all = n.reshape(L, H * D, D)
    w2 = jnp.transpose(params["lin2_w"], (0, 2, 1))                    # (L, FF, D)
    w_n = jnp.concatenate([n_all, w2], axis=1).astype(MATMUL_DTYPE)    # (L, 4D+FF, D)
    w_1 = jnp.transpose(params["lin1_w"], (0, 2, 1)).astype(MATMUL_DTYPE)  # (L, D, FF)

    def row(v):
        v = jnp.asarray(v, jnp.float32).reshape(-1)
        return jnp.pad(v, (0, VEC_LANES - v.shape[0]))

    layers = []
    for l in range(L):
        layers.append(jnp.stack([
            row(params["norm1_w"][l]), row(params["norm1_b"][l]),
            row(params["norm2_w"][l]), row(params["norm2_b"][l]),
            row(aconst[l]), row(params["lin2_b"][l]), row(params["lin1_b"][l]),
            row(sbias[l].reshape(-1)),                   # lane-concat sbias over heads
        ]))
    vecs = jnp.stack(layers)                              # (L, VEC_ROWS, 4D)
    pool = params["fc_w"].reshape(1, D).astype(jnp.float32)

    assert w_m.shape == (L, D, H * D)
    assert w_n.shape == (L, H * D + FF, D)
    assert w_1.shape == (L, D, FF)
    assert vecs.shape == (L, VEC_ROWS, VEC_LANES)
    return w_m, w_n, w_1, vecs, pool


@jax.jit
def global_aggregator(seg_embs, w_m, w_n, w_1, vecs, pool):
    """seg_embs: (K, d_model) f32 -> (d_model,) f32.  Packed slabs come from
    prepare_params() (called once; no per-call transposes or packing)."""
    K = seg_embs.shape[0]
    out = pl.pallas_call(
        global_agg_kernel,
        out_shape=jax.ShapeDtypeStruct((1, D_MODEL), jnp.float32),
        grid_spec=pltpu.PrefetchScalarGridSpec(
            num_scalar_prefetch=0,
            grid=(NUM_LAYERS,),
            in_specs=[
                pl.BlockSpec((K, D_MODEL), lambda l: (0, 0)),                 # x
                pl.BlockSpec((1, D_MODEL, ALL_HEADS), lambda l: (l, 0, 0)),   # M_all
                pl.BlockSpec((1, ALL_HEADS + DIM_FF, D_MODEL),
                             lambda l: (l, 0, 0)),                           # [N_all;W2]
                pl.BlockSpec((1, D_MODEL, DIM_FF), lambda l: (l, 0, 0)),      # W1
                pl.BlockSpec((1, VEC_ROWS, VEC_LANES), lambda l: (l, 0, 0)),  # biases
                pl.BlockSpec((1, D_MODEL), lambda l: (0, 0)),                 # pool fc_w
            ],
            out_specs=pl.BlockSpec((1, D_MODEL), lambda l: (0, 0)),
            scratch_shapes=[pltpu.VMEM((K, D_MODEL), jnp.float32)],
        ),
        compiler_params=pltpu.CompilerParams(
            dimension_semantics=("arbitrary",)),
    )(seg_embs, w_m, w_n, w_1, vecs, pool)
    return out[0]


def reference_jax(seg_embs, params):
    """Pure-JAX f32 mirror of the PyTorch forward (correctness oracle)."""
    x = seg_embs
    scale = 1.0 / math.sqrt(HEAD_DIM)
    for l in range(NUM_LAYERS):
        xn = _layer_norm(x, params["norm1_w"][l], params["norm1_b"][l])
        qkv = xn @ params["in_proj_w"][l].T + params["in_proj_b"][l]
        q, k, v = qkv[:, :D_MODEL], qkv[:, D_MODEL:2 * D_MODEL], qkv[:, 2 * D_MODEL:]
        heads = []
        for h in range(NHEAD):
            lo, hi = h * HEAD_DIM, (h + 1) * HEAD_DIM
            s = (q[:, lo:hi] @ k[:, lo:hi].T) * scale
            p = jax.nn.softmax(s, axis=-1)
            heads.append(p @ v[:, lo:hi])
        attn = (jnp.concatenate(heads, axis=-1) @ params["out_proj_w"][l].T
                + params["out_proj_b"][l])
        x = x + attn
        xn2 = _layer_norm(x, params["norm2_w"][l], params["norm2_b"][l])
        h1 = jax.nn.relu(xn2 @ params["lin1_w"][l].T + params["lin1_b"][l])
        x = x + (h1 @ params["lin2_w"][l].T + params["lin2_b"][l])
    scores = x @ params["fc_w"].T + params["fc_b"]          # (K, 1)
    alpha = jax.nn.softmax(scores, axis=0)
    return (alpha.T @ x)[0]


def init_params(key):
    ks = jax.random.split(key, 10)
    L, D, FF = NUM_LAYERS, D_MODEL, DIM_FF

    def w(k, shape, scale=0.05):
        return (scale * jax.random.normal(k, shape)).astype(jnp.float32)

    return dict(
        in_proj_w=w(ks[0], (L, 3 * D, D)),
        in_proj_b=w(ks[1], (L, 1, 3 * D)),
        out_proj_w=w(ks[2], (L, D, D)),
        out_proj_b=w(ks[3], (L, 1, D)),
        lin1_w=w(ks[4], (L, FF, D)),
        lin1_b=w(ks[5], (L, 1, FF)),
        lin2_w=w(ks[6], (L, D, FF)),
        lin2_b=w(ks[7], (L, 1, D)),
        norm1_w=jnp.ones((L, 1, D), jnp.float32),
        norm1_b=jnp.zeros((L, 1, D), jnp.float32),
        norm2_w=jnp.ones((L, 1, D), jnp.float32),
        norm2_b=jnp.zeros((L, 1, D), jnp.float32),
        fc_w=w(ks[8], (1, D)),
        fc_b=jnp.zeros((1, 1), jnp.float32),
    )


if __name__ == "__main__":
    key = jax.random.PRNGKey(0)
    k_x, k_p = jax.random.split(key)
    K = 8  # number of segment embeddings (sequence length)
    seg_embs = jax.random.normal(k_x, (K, D_MODEL), dtype=jnp.float32)
    params = init_params(k_p)

    # One-time packing/folding (outside the per-call path).
    packed = jax.block_until_ready(prepare_params(params))

    out = global_aggregator(seg_embs, *packed)
    out = jax.block_until_ready(out)
    assert out.shape == (D_MODEL,), out.shape

    ref = jax.block_until_ready(reference_jax(seg_embs, params))
    # bf16 MXU-input tolerance: LayerNorm/softmax/accumulation are f32; the f32
    # reference differs only by bf16 rounding of the folded weights/activations at
    # the dots (and the approx EUP reciprocals).
    np.testing.assert_allclose(np.asarray(out), np.asarray(ref), rtol=2e-2, atol=2e-2)

    print("KERNEL_OK")
</pallas_src>

<mosaic_0001>
module attributes {stable_mosaic.version = 11 : i64} {
  func.func @global_agg_kernel(%arg0: i32, %arg1: memref<8x128xf32, #tpu.memory_space<vmem>>, %arg2: memref<1x128x512xbf16, #tpu.memory_space<vmem>>, %arg3: memref<1x768x128xbf16, #tpu.memory_space<vmem>>, %arg4: memref<1x128x256xbf16, #tpu.memory_space<vmem>>, %arg5: memref<1x8x512xf32, #tpu.memory_space<vmem>>, %arg6: memref<1x128xf32, #tpu.memory_space<vmem>>, %arg7: memref<1x128xf32, #tpu.memory_space<vmem>>, %arg8: memref<8x128xf32, #tpu.memory_space<vmem>>) attributes {dimension_semantics = [#tpu.dimension_semantics<arbitrary>], iteration_bounds = array<i64: 2>, scalar_prefetch = 0 : i64, scratch_operands = 1 : i64, tpu.core_type = #tpu.core_type<tc>, window_params = [{pipeline_mode = #tpu.pipeline_mode<synchronous>, transform_indices = @transform_0, window_bounds = array<i64: 8, 128>}, {transform_indices = @transform_1, window_bounds = array<i64: 1, 128, 512>}, {transform_indices = @transform_2, window_bounds = array<i64: 1, 768, 128>}, {transform_indices = @transform_3, window_bounds = array<i64: 1, 128, 256>}, {transform_indices = @transform_4, window_bounds = array<i64: 1, 8, 512>}, {pipeline_mode = #tpu.pipeline_mode<synchronous>, transform_indices = @transform_5, window_bounds = array<i64: 1, 128>}, {pipeline_mode = #tpu.pipeline_mode<synchronous>, transform_indices = @transform_6, window_bounds = array<i64: 1, 128>}]} {
    %c0_i32 = arith.constant 0 : i32
    %0 = arith.cmpi eq, %arg0, %c0_i32 : i32
    %1 = arith.extui %0 : i1 to i32
    %c0_i32_0 = arith.constant 0 : i32
    %2 = arith.cmpi ne, %1, %c0_i32_0 : i32
    scf.if %2 {
      %c0_57 = arith.constant 0 : index
      %c0_58 = arith.constant 0 : index
      %125 = vector.load %arg1[%c0_57, %c0_58] : memref<8x128xf32, #tpu.memory_space<vmem>>, vector<8x128xf32>
      %c0_59 = arith.constant 0 : index
      %c0_60 = arith.constant 0 : index
      %126 = vector.load %arg8[%c0_59, %c0_60] : memref<8x128xf32, #tpu.memory_space<vmem>>, vector<8x128xf32>
      tpu.vector_store %arg8[%c0_59, %c0_60], %125 {strides = array<i32>} : memref<8x128xf32, #tpu.memory_space<vmem>>, vector<8x128xf32>,
    } else {
    }
    %c0 = arith.constant 0 : index
    %c0_1 = arith.constant 0 : index
    %3 = vector.load %arg8[%c0, %c0_1] : memref<8x128xf32, #tpu.memory_space<vmem>>, vector<8x128xf32>
    %c0_2 = arith.constant 0 : index
    %c0_3 = arith.constant 0 : index
    %c0_4 = arith.constant 0 : index
    %4 = vector.load %arg5[%c0_2, %c0_3, %c0_4] : memref<1x8x512xf32, #tpu.memory_space<vmem>>, vector<1x1x128xf32>
    %5 = vector.shape_cast %4 : vector<1x1x128xf32> to vector<1x128xf32>
    %c0_5 = arith.constant 0 : index
    %c1 = arith.constant 1 : index
    %c0_6 = arith.constant 0 : index
    %6 = vector.load %arg5[%c0_5, %c1, %c0_6] : memref<1x8x512xf32, #tpu.memory_space<vmem>>, vector<1x1x128xf32>
    %7 = vector.shape_cast %6 : vector<1x1x128xf32> to vector<1x128xf32>
    %cst = arith.constant dense<0.000000e+00> : vector<8xf32>
    %8 = vector.multi_reduction <add>, %3, %cst [1] : vector<8x128xf32> to vector<8xf32>
    %9 = vector.shape_cast %8 : vector<8xf32> to vector<8x1xf32>
    %cst_7 = arith.constant 1.280000e+02 : f32
    %10 = vector.broadcast %cst_7 : f32 to vector<8x1xf32>
    %11 = arith.divf %9, %10 : vector<8x1xf32>
    %12 = vector.broadcast %11 : vector<8x1xf32> to vector<8x128xf32>
    %13 = arith.subf %3, %12 : vector<8x128xf32>
    %14 = arith.mulf %13, %13 : vector<8x128xf32>
    %cst_8 = arith.constant dense<0.000000e+00> : vector<8xf32>
    %15 = vector.multi_reduction <add>, %14, %cst_8 [1] : vector<8x128xf32> to vector<8xf32>
    %16 = vector.shape_cast %15 : vector<8xf32> to vector<8x1xf32>
    %cst_9 = arith.constant 1.280000e+02 : f32
    %17 = vector.broadcast %cst_9 : f32 to vector<8x1xf32>
    %18 = arith.divf %16, %17 : vector<8x1xf32>
    %19 = vector.broadcast %11 : vector<8x1xf32> to vector<8x128xf32>
    %20 = arith.subf %3, %19 : vector<8x128xf32>
    %cst_10 = arith.constant 9.99999974E-6 : f32
    %21 = vector.broadcast %cst_10 : f32 to vector<8x1xf32>
    %22 = arith.addf %18, %21 : vector<8x1xf32>
    %23 = math.rsqrt %22 : vector<8x1xf32>
    %24 = vector.broadcast %23 : vector<8x1xf32> to vector<8x128xf32>
    %25 = arith.mulf %20, %24 : vector<8x128xf32>
    %26 = vector.broadcast %5 : vector<1x128xf32> to vector<8x128xf32>
    %27 = arith.mulf %25, %26 : vector<8x128xf32>
    %28 = vector.broadcast %7 : vector<1x128xf32> to vector<8x128xf32>
    %29 = arith.addf %27, %28 : vector<8x128xf32>
    %30 = arith.truncf %29 : vector<8x128xf32> to vector<8x128xbf16>
    %c0_11 = arith.constant 0 : index
    %c0_12 = arith.constant 0 : index
    %c0_13 = arith.constant 0 : index
    %31 = vector.load %arg2[%c0_11, %c0_12, %c0_13] : memref<1x128x512xbf16, #tpu.memory_space<vmem>>, vector<1x128x512xbf16>
    %32 = vector.shape_cast %31 : vector<1x128x512xbf16> to vector<128x512xbf16>
    %cst_14 = arith.constant dense<0.000000e+00> : vector<8x512xf32>
    %33 = tpu.matmul %30, %32, %cst_14 {dimension_numbers = #tpu.dot_dimension_numbers<[1], [0], [0], [1], [0, 0, 1, 1], [], []>} : vector<8x128xbf16>, vector<128x512xbf16>, vector<8x512xf32> -> vector<8x512xf32>
    %c0_15 = arith.constant 0 : index
    %c7 = arith.constant 7 : index
    %c0_16 = arith.constant 0 : index
    %34 = vector.load %arg5[%c0_15, %c7, %c0_16] : memref<1x8x512xf32, #tpu.memory_space<vmem>>, vector<1x1x512xf32>
    %35 = vector.shape_cast %34 : vector<1x1x512xf32> to vector<1x512xf32>
    %36 = vector.broadcast %35 : vector<1x512xf32> to vector<8x512xf32>
    %37 = arith.addf %33, %36 : vector<8x512xf32>
    %38 = arith.truncf %37 : vector<8x512xf32> to vector<8x512xbf16>
    %39 = vector.extract_strided_slice %38 {offsets = [0, 0], sizes = [8, 128], strides = [1, 1]} : vector<8x512xbf16> to vector<8x128xbf16>
    %cst_17 = arith.constant dense<0.000000e+00> : vector<8x8xf32>
    %40 = tpu.matmul %39, %30, %cst_17 {dimension_numbers = #tpu.dot_dimension_numbers<[1], [1], [0], [0], [0, 0, 1, 0], [], []>} : vector<8x128xbf16>, vector<8x128xbf16>, vector<8x8xf32> -> vector<8x8xf32>
    %41 = vector.extract_strided_slice %38 {offsets = [0, 128], sizes = [8, 128], strides = [1, 1]} : vector<8x512xbf16> to vector<8x128xbf16>
    %cst_18 = arith.constant dense<0.000000e+00> : vector<8x8xf32>
    %42 = tpu.matmul %41, %30, %cst_18 {dimension_numbers = #tpu.dot_dimension_numbers<[1], [1], [0], [0], [0, 0, 1, 0], [], []>} : vector<8x128xbf16>, vector<8x128xbf16>, vector<8x8xf32> -> vector<8x8xf32>
    %43 = vector.extract_strided_slice %38 {offsets = [0, 256], sizes = [8, 128], strides = [1, 1]} : vector<8x512xbf16> to vector<8x128xbf16>
    %cst_19 = arith.constant dense<0.000000e+00> : vector<8x8xf32>
    %44 = tpu.matmul %43, %30, %cst_19 {dimension_numbers = #tpu.dot_dimension_numbers<[1], [1], [0], [0], [0, 0, 1, 0], [], []>} : vector<8x128xbf16>, vector<8x128xbf16>, vector<8x8xf32> -> vector<8x8xf32>
    %45 = vector.extract_strided_slice %38 {offsets = [0, 384], sizes = [8, 128], strides = [1, 1]} : vector<8x512xbf16> to vector<8x128xbf16>
    %cst_20 = arith.constant dense<0.000000e+00> : vector<8x8xf32>
    %46 = tpu.matmul %45, %30, %cst_20 {dimension_numbers = #tpu.dot_dimension_numbers<[1], [1], [0], [0], [0, 0, 1, 0], [], []>} : vector<8x128xbf16>, vector<8x128xbf16>, vector<8x8xf32> -> vector<8x8xf32>
    %47 = tpu.concatenate %40, %42, %44, %46 in 0 : vector<8x8xf32>, vector<8x8xf32>, vector<8x8xf32>, vector<8x8xf32> -> vector<32x8xf32>
    %cst_21 = arith.constant dense<0xFF800000> : vector<32xf32>
    %48 = vector.multi_reduction <maximumf>, %47, %cst_21 [1] : vector<32x8xf32> to vector<32xf32>
    %49 = vector.shape_cast %48 : vector<32xf32> to vector<32x1xf32>
    %50 = vector.broadcast %49 : vector<32x1xf32> to vector<32x8xf32>
    %51 = arith.subf %47, %50 : vector<32x8xf32>
    %52 = math.exp %51 : vector<32x8xf32>
    %cst_22 = arith.constant dense<0.000000e+00> : vector<32xf32>
    %53 = vector.multi_reduction <add>, %52, %cst_22 [1] : vector<32x8xf32> to vector<32xf32>
    %54 = vector.shape_cast %53 : vector<32xf32> to vector<32x1xf32>
    %55 = tpu.reciprocal %54 {approx = true} : vector<32x1xf32> -> vector<32x1xf32>
    %56 = vector.broadcast %55 : vector<32x1xf32> to vector<32x8xf32>
    %57 = arith.mulf %52, %56 : vector<32x8xf32>
    %58 = vector.extract_strided_slice %57 {offsets = [0, 0], sizes = [8, 8], strides = [1, 1]} : vector<32x8xf32> to vector<8x8xf32>
    %cst_23 = arith.constant dense<0.000000e+00> : vector<8x128xf32>
    %59 = tpu.matmul %58, %29, %cst_23 {dimension_numbers = #tpu.dot_dimension_numbers<[1], [0], [0], [1], [0, 0, 1, 1], [], []>} : vector<8x8xf32>, vector<8x128xf32>, vector<8x128xf32> -> vector<8x128xf32>
    %60 = vector.extract_strided_slice %57 {offsets = [8, 0], sizes = [8, 8], strides = [1, 1]} : vector<32x8xf32> to vector<8x8xf32>
    %cst_24 = arith.constant dense<0.000000e+00> : vector<8x128xf32>
    %61 = tpu.matmul %60, %29, %cst_24 {dimension_numbers = #tpu.dot_dimension_numbers<[1], [0], [0], [1], [0, 0, 1, 1], [], []>} : vector<8x8xf32>, vector<8x128xf32>, vector<8x128xf32> -> vector<8x128xf32>
    %62 = vector.extract_strided_slice %57 {offsets = [16, 0], sizes = [8, 8], strides = [1, 1]} : vector<32x8xf32> to vector<8x8xf32>
    %cst_25 = arith.constant dense<0.000000e+00> : vector<8x128xf32>
    %63 = tpu.matmul %62, %29, %cst_25 {dimension_numbers = #tpu.dot_dimension_numbers<[1], [0], [0], [1], [0, 0, 1, 1], [], []>} : vector<8x8xf32>, vector<8x128xf32>, vector<8x128xf32> -> vector<8x128xf32>
    %64 = vector.extract_strided_slice %57 {offsets = [24, 0], sizes = [8, 8], strides = [1, 1]} : vector<32x8xf32> to vector<8x8xf32>
    %cst_26 = arith.constant dense<0.000000e+00> : vector<8x128xf32>
    %65 = tpu.matmul %64, %29, %cst_26 {dimension_numbers = #tpu.dot_dimension_numbers<[1], [0], [0], [1], [0, 0, 1, 1], [], []>} : vector<8x8xf32>, vector<8x128xf32>, vector<8x128xf32> -> vector<8x128xf32>
    %66 = tpu.concatenate %59, %61, %63, %65 in 1 : vector<8x128xf32>, vector<8x128xf32>, vector<8x128xf32>, vector<8x128xf32> -> vector<8x512xf32>
    %67 = arith.truncf %66 : vector<8x512xf32> to vector<8x512xbf16>
    %c0_27 = arith.constant 0 : index
    %c0_28 = arith.constant 0 : index
    %c0_29 = arith.constant 0 : index
    %68 = vector.load %arg3[%c0_27, %c0_28, %c0_29] : memref<1x768x128xbf16, #tpu.memory_space<vmem>>, vector<1x512x128xbf16>
    %69 = vector.shape_cast %68 : vector<1x512x128xbf16> to vector<512x128xbf16>
    %cst_30 = arith.constant dense<0.000000e+00> : vector<8x128xf32>
    %70 = tpu.matmul %67, %69, %cst_30 {dimension_numbers = #tpu.dot_dimension_numbers<[1], [0], [0], [1], [0, 0, 1, 1], [], []>} : vector<8x512xbf16>, vector<512x128xbf16>, vector<8x128xf32> -> vector<8x128xf32>
    %71 = arith.addf %3, %70 : vector<8x128xf32>
    %c0_31 = arith.constant 0 : index
    %c4 = arith.constant 4 : index
    %c0_32 = arith.constant 0 : index
    %72 = vector.load %arg5[%c0_31, %c4, %c0_32] : memref<1x8x512xf32, #tpu.memory_space<vmem>>, vector<1x1x128xf32>
    %73 = vector.shape_cast %72 : vector<1x1x128xf32> to vector<1x128xf32>
    %74 = vector.broadcast %73 : vector<1x128xf32> to vector<8x128xf32>
    %75 = arith.addf %71, %74 : vector<8x128xf32>
    %c0_33 = arith.constant 0 : index
    %c2 = arith.constant 2 : index
    %c0_34 = arith.constant 0 : index
    %76 = vector.load %arg5[%c0_33, %c2, %c0_34] : memref<1x8x512xf32, #tpu.memory_space<vmem>>, vector<1x1x128xf32>
    %77 = vector.shape_cast %76 : vector<1x1x128xf32> to vector<1x128xf32>
    %c0_35 = arith.constant 0 : index
    %c3 = arith.constant 3 : index
    %c0_36 = arith.constant 0 : index
    %78 = vector.load %arg5[%c0_35, %c3, %c0_36] : memref<1x8x512xf32, #tpu.memory_space<vmem>>, vector<1x1x128xf32>
    %79 = vector.shape_cast %78 : vector<1x1x128xf32> to vector<1x128xf32>
    %cst_37 = arith.constant dense<0.000000e+00> : vector<8xf32>
    %80 = vector.multi_reduction <add>, %75, %cst_37 [1] : vector<8x128xf32> to vector<8xf32>
    %81 = vector.shape_cast %80 : vector<8xf32> to vector<8x1xf32>
    %cst_38 = arith.constant 1.280000e+02 : f32
    %82 = vector.broadcast %cst_38 : f32 to vector<8x1xf32>
    %83 = arith.divf %81, %82 : vector<8x1xf32>
    %84 = vector.broadcast %83 : vector<8x1xf32> to vector<8x128xf32>
    %85 = arith.subf %75, %84 : vector<8x128xf32>
    %86 = arith.mulf %85, %85 : vector<8x128xf32>
    %cst_39 = arith.constant dense<0.000000e+00> : vector<8xf32>
    %87 = vector.multi_reduction <add>, %86, %cst_39 [1] : vector<8x128xf32> to vector<8xf32>
    %88 = vector.shape_cast %87 : vector<8xf32> to vector<8x1xf32>
    %cst_40 = arith.constant 1.280000e+02 : f32
    %89 = vector.broadcast %cst_40 : f32 to vector<8x1xf32>
    %90 = arith.divf %88, %89 : vector<8x1xf32>
    %91 = vector.broadcast %83 : vector<8x1xf32> to vector<8x128xf32>
    %92 = arith.subf %75, %91 : vector<8x128xf32>
    %cst_41 = arith.constant 9.99999974E-6 : f32
    %93 = vector.broadcast %cst_41 : f32 to vector<8x1xf32>
    %94 = arith.addf %90, %93 : vector<8x1xf32>
    %95 = math.rsqrt %94 : vector<8x1xf32>
    %96 = vector.broadcast %95 : vector<8x1xf32> to vector<8x128xf32>
    %97 = arith.mulf %92, %96 : vector<8x128xf32>
    %98 = vector.broadcast %77 : vector<1x128xf32> to vector<8x128xf32>
    %99 = arith.mulf %97, %98 : vector<8x128xf32>
    %100 = vector.broadcast %79 : vector<1x128xf32> to vector<8x128xf32>
    %101 = arith.addf %99, %100 : vector<8x128xf32>
    %c0_42 = arith.constant 0 : index
    %c0_43 = arith.constant 0 : index
    %c0_44 = arith.constant 0 : index
    %102 = vector.load %arg4[%c0_42, %c0_43, %c0_44] : memref<1x128x256xbf16, #tpu.memory_space<vmem>>, vector<1x128x256xbf16>
    %103 = vector.shape_cast %102 : vector<1x128x256xbf16> to vector<128x256xbf16>
    %c0_45 = arith.constant 0 : index
    %c512 = arith.constant 512 : index
    %c0_46 = arith.constant 0 : index
    %104 = vector.load %arg3[%c0_45, %c512, %c0_46] : memref<1x768x128xbf16, #tpu.memory_space<vmem>>, vector<1x256x128xbf16>
    %105 = vector.shape_cast %104 : vector<1x256x128xbf16> to vector<256x128xbf16>
    %106 = arith.truncf %101 : vector<8x128xf32> to vector<8x128xbf16>
    %cst_47 = arith.constant dense<0.000000e+00> : vector<8x256xf32>
    %107 = tpu.matmul %106, %103, %cst_47 {dimension_numbers = #tpu.dot_dimension_numbers<[1], [0], [0], [1], [0, 0, 1, 1], [], []>} : vector<8x128xbf16>, vector<128x256xbf16>, vector<8x256xf32> -> vector<8x256xf32>
    %c0_48 = arith.constant 0 : index
    %c6 = arith.constant 6 : index
    %c0_49 = arith.constant 0 : index
    %108 = vector.load %arg5[%c0_48, %c6, %c0_49] : memref<1x8x512xf32, #tpu.memory_space<vmem>>, vector<1x1x256xf32>
    %109 = vector.shape_cast %108 : vector<1x1x256xf32> to vector<1x256xf32>
    %110 = vector.broadcast %109 : vector<1x256xf32> to vector<8x256xf32>
    %111 = arith.addf %107, %110 : vector<8x256xf32>
    %cst_50 = arith.constant 0.000000e+00 : f32
    %112 = vector.broadcast %cst_50 : f32 to vector<8x256xf32>
    %113 = arith.maximumf %111, %112 : vector<8x256xf32>
    %114 = arith.truncf %113 : vector<8x256xf32> to vector<8x256xbf16>
    %cst_51 = arith.constant dense<0.000000e+00> : vector<8x128xf32>
    %115 = tpu.matmul %114, %105, %cst_51 {dimension_numbers = #tpu.dot_dimension_numbers<[1], [0], [0], [1], [0, 0, 1, 1], [], []>} : vector<8x256xbf16>, vector<256x128xbf16>, vector<8x128xf32> -> vector<8x128xf32>
    %c0_52 = arith.constant 0 : index
    %c5 = arith.constant 5 : index
    %c0_53 = arith.constant 0 : index
    %116 = vector.load %arg5[%c0_52, %c5, %c0_53] : memref<1x8x512xf32, #tpu.memory_space<vmem>>, vector<1x1x128xf32>
    %117 = vector.shape_cast %116 : vector<1x1x128xf32> to vector<1x128xf32>
    %118 = vector.broadcast %117 : vector<1x128xf32> to vector<8x128xf32>
    %119 = arith.addf %115, %118 : vector<8x128xf32>
    %120 = arith.addf %75, %119 : vector<8x128xf32>
    %c0_54 = arith.constant 0 : index
    %c0_55 = arith.constant 0 : index
    %121 = vector.load %arg8[%c0_54, %c0_55] : memref<8x128xf32, #tpu.memory_space<vmem>>, vector<8x128xf32>
    tpu.vector_store %arg8[%c0_54, %c0_55], %120 {strides = array<i32>} : memref<8x128xf32, #tpu.memory_space<vmem>>, vector<8x128xf32>,
    %c1_i32 = arith.constant 1 : i32
    %122 = arith.cmpi eq, %arg0, %c1_i32 : i32
    %123 = arith.extui %122 : i1 to i32
    %c0_i32_56 = arith.constant 0 : i32
    %124 = arith.cmpi ne, %123, %c0_i32_56 : i32
    scf.if %124 {
      %c0_57 = arith.constant 0 : index
      %c0_58 = arith.constant 0 : index
      %125 = vector.load %arg6[%c0_57, %c0_58] : memref<1x128xf32, #tpu.memory_space<vmem>>, vector<1x128xf32>
      %126 = vector.broadcast %125 : vector<1x128xf32> to vector<8x128xf32>
      %127 = arith.mulf %120, %126 : vector<8x128xf32>
      %cst_59 = arith.constant dense<0.000000e+00> : vector<8xf32>
      %128 = vector.multi_reduction <add>, %127, %cst_59 [1] : vector<8x128xf32> to vector<8xf32>
      %129 = vector.shape_cast %128 : vector<8xf32> to vector<8x1xf32>
      %cst_60 = arith.constant dense<0xFF800000> : vector<1xf32>
      %130 = vector.multi_reduction <maximumf>, %129, %cst_60 [0] : vector<8x1xf32> to vector<1xf32>
      %131 = vector.shape_cast %130 : vector<1xf32> to vector<1x1xf32>
      %132 = vector.broadcast %131 : vector<1x1xf32> to vector<8x1xf32>
      %133 = arith.subf %129, %132 : vector<8x1xf32>
      %134 = math.exp %133 : vector<8x1xf32>
      %cst_61 = arith.constant dense<0.000000e+00> : vector<1xf32>
      %135 = vector.multi_reduction <add>, %134, %cst_61 [0] : vector<8x1xf32> to vector<1xf32>
      %136 = vector.shape_cast %135 : vector<1xf32> to vector<1x1xf32>
      %137 = tpu.reciprocal %136 {approx = true} : vector<1x1xf32> -> vector<1x1xf32>
      %138 = vector.broadcast %137 : vector<1x1xf32> to vector<8x1xf32>
      %139 = arith.mulf %134, %138 : vector<8x1xf32>
      %140 = vector.broadcast %139 : vector<8x1xf32> to vector<8x128xf32>
      %141 = arith.mulf %140, %120 : vector<8x128xf32>
      %cst_62 = arith.constant dense<0.000000e+00> : vector<128xf32>
      %142 = vector.multi_reduction <add>, %141, %cst_62 [0] : vector<8x128xf32> to vector<128xf32>
      %143 = vector.shape_cast %142 : vector<128xf32> to vector<1x128xf32>
      %c0_63 = arith.constant 0 : index
      %c0_64 = arith.constant 0 : index
      %144 = vector.load %arg7[%c0_63, %c0_64] : memref<1x128xf32, #tpu.memory_space<vmem>>, vector<1x128xf32>
      tpu.vector_store %arg7[%c0_63, %c0_64], %143 {strides = array<i32>} : memref<1x128xf32, #tpu.memory_space<vmem>>, vector<1x128xf32>,
    } else {
    }
    return
  }
  func.func @transform_0(%arg0: i32) -> (i32, i32) {
    %c0_i32 = arith.constant 0 : i32
    %c0_i32_0 = arith.constant 0 : i32
    %c0_i32_1 = arith.constant 0 : i32
    return %c0_i32, %c0_i32_0 : i32, i32
  }
  func.func @transform_1(%arg0: i32) -> (i32, i32, i32) {
    %c0_i32 = arith.constant 0 : i32
    %c0_i32_0 = arith.constant 0 : i32
    %c0_i32_1 = arith.constant 0 : i32
    return %arg0, %c0_i32, %c0_i32_0 : i32, i32, i32
  }
  func.func @transform_2(%arg0: i32) -> (i32, i32, i32) {
    %c0_i32 = arith.constant 0 : i32
    %c0_i32_0 = arith.constant 0 : i32
    %c0_i32_1 = arith.constant 0 : i32
    return %arg0, %c0_i32, %c0_i32_0 : i32, i32, i32
  }
  func.func @transform_3(%arg0: i32) -> (i32, i32, i32) {
    %c0_i32 = arith.constant 0 : i32
    %c0_i32_0 = arith.constant 0 : i32
    %c0_i32_1 = arith.constant 0 : i32
    return %arg0, %c0_i32, %c0_i32_0 : i32, i32, i32
  }
  func.func @transform_4(%arg0: i32) -> (i32, i32, i32) {
    %c0_i32 = arith.constant 0 : i32
    %c0_i32_0 = arith.constant 0 : i32
    %c0_i32_1 = arith.constant 0 : i32
    return %arg0, %c0_i32, %c0_i32_0 : i32, i32, i32
  }
  func.func @transform_5(%arg0: i32) -> (i32, i32) {
    %c0_i32 = arith.constant 0 : i32
    %c0_i32_0 = arith.constant 0 : i32
    %c0_i32_1 = arith.constant 0 : i32
    return %c0_i32, %c0_i32_0 : i32, i32
  }
  func.func @transform_6(%arg0: i32) -> (i32, i32) {
    %c0_i32 = arith.constant 0 : i32
    %c0_i32_0 = arith.constant 0 : i32
    %c0_i32_1 = arith.constant 0 : i32
    return %c0_i32, %c0_i32_0 : i32, i32
  }
}

</mosaic_0001>

<bundles_post_ra>
// kernel: global_aggregator.1
= control target key start
LH: loop header
LB: loop body
LE: loop exit
PB: predicated region body
PF: predicated region fallthrough
CT: control target
= control target key end

     0   :  { %s2964_s0 = inlined_call_operand.hbm [shape: f32[8,128], index: 0, kind: input, shape index: {}]   ;;  %s2965_s1 = inlined_call_operand.hbm [shape: bf16[2,128,512], index: 1, kind: input, shape index: {}]   ;;  %s2966_s2 = inlined_call_operand.hbm [shape: bf16[2,768,128], index: 2, kind: input, shape index: {}]   ;;  %s2967_s3 = inlined_call_operand.hbm [shape: bf16[2,128,256], index: 3, kind: input, shape index: {}]   ;;  %s2968_s4 = inlined_call_operand.hbm [shape: f32[2,8,512], index: 4, kind: input, shape index: {}]   ;;  %s2969_s5 = inlined_call_operand.vmem [shape: f32[1,128], index: 5, kind: input, shape index: {}]   ;;  %s2970_s6 = inlined_call_operand.hbm [shape: f32[1,128], index: 6, kind: output, shape index: {}]  }
   0x1   :  { %2971 = sst [smem:[#allocation17_spill]] %s2964_s0 }
   0x2   :  { %2972 = sst [smem:[#allocation18_spill]] %s2965_s1 }
   0x3   :  { %2973 = sst [smem:[#allocation19_spill]] %s2967_s3 }
   0x4   :  { %11 = vsyncpa [#allocation4], 0 }
   0x5   :  { %12 = vsyncpa [#allocation7], 0 }
   0x6   :  { %14 = vsyncpa [#allocation7 + $0x1], 0 }
   0x7   :  { %15 = vsyncpa [#allocation10], 0 }
   0x8   :  { %17 = vsyncpa [#allocation10 + $0x1], 0 }
   0x9   :  { %18 = vsyncpa [#allocation5], 0  ;;  %s2580_s21 = smov 0   ;;  %s2582_s22 = smov 0  }
   0xa   :  { %s2584_s23 = smov 0   ;;  %s2586_s24 = smov 0  }
   0xb LB: > { %s2601_s25 = sadd.s32 1, %s2534_s24   ;;  %s52_s26 = sadd.s32 1, %s2530_s23  ;;  %s2534_s24 = sphi %s2586_s24, %s2983_s24   ;;  %s2530_s23 = sphi %s2584_s23, %s2982_s23   ;;  %s2526_s22 = sphi %s2582_s22, %s2981_s22   ;;  %s2522_s21 = sphi %s2580_s21, %s2980_s21  }
   0xc   : > { %s49_s27 = ssub.s32 %s2534_s24, %s2601_s25  ;;  %p59_p0 = scmp.ne.s32.totalorder %s2530_s23, %s2526_s22 }
   0xd   : > { %p50_p1 = scmp.eq.s32.totalorder %s49_s27, 0  ;;  %p60_p2 = scmp.eq.s32.totalorder %s2534_s24, 0 }
   0xe   : > { %p2238_p3 = scmp.lt.s32.totalorder %s2534_s24, 2  ;;  %s224_s29 = sand.u32 1, %s2534_s24  }
   0xf   : > { %s2611_s28 = scalar_select %p50_p1, %s2530_s23, %s52_s26  }
  0x10   : > { %p61_p4 = por %p60_p2, %p59_p0  ;;  %s2615_s30 = sand.u32 1, %s2530_s23  }
  0x11   : > { %s1691_s7 = sshll.u32 %s2615_s30, 8  ;;  %s2102_s8 = sshll.u32 %s2534_s24, 8 }
  0x12   : > { %s2974_s1 = sld [smem:[#allocation18_spill]]  ;;  %s228_s13 = scalar_lea.vmem [#allocation6], %s1691_s7 }
  0x13   : > { %s236_s14 = sshll.u32 %s228_s13, 4  ;;  %p2624_p5 = pnand %p2238_p3, %p61_p4  ;;  %s237_s14 = int_to_ptr.vmem [resolvable:$true] %s236_s14 }
  0x14   : > { %s1695_s16 = sshll.u32 %s2615_s30, 7  ;;  %s2631_s17 = scalar_lea.sflag [#allocation7], %s224_s29 }
  0x15   : > { %p2314_p7 = pneg %p2624_p5 }
  0x18   : > { %s233_s11 = scalar_lea.hbm %s2974_s1, %s2102_s8  ;;  %s2317_s27 = scalar_lea.hbm %s2974_s1, 512 }
  0x19   : > { %s234_s12 = sshll.u32 %s233_s11, 4  ;;  %s235_s12 = int_to_ptr.hbm [resolvable:$true] %s234_s12 }
  0x1a   : > { %s2310_s18 = sshra.s32 %s235_s12, 4  ;;  %s2311_s18 = int_to_ptr.hbm [resolvable:$true] %s2310_s18 }
  0x1b   : > { %s2312_s19 = scalar_lea.hbm %s2311_s18, 256  ;;  %p2318_p10 = scmp.lt.s32.totalorder %s2311_s18, %s2974_s1 }
  0x1c   : > { %p2313_p6 = scmp.ne.s32.totalorder %s2311_s18, %s2312_s19  ;;  %p2319_p11 = scmp.lt.s32.totalorder %s2317_s27, %s2312_s19 }
  0x1e   : > { %p2315_p8 = pnand %p2314_p7, %p2313_p6  ;;  %p2320_p12 = por %p2319_p11, %p2318_p10 }
  0x20   : > { %p2316_p9 = pneg %p2315_p8 }
  0x22   : > { %p2321_p13 = pnand %p2320_p12, %p2316_p9 }
  0x24   : > { %2324 = shalt.err (!%p2321_p13)
}
  0x25   : > { %s2536_s9 = smov 256   ;;  %s2537_s10 = smov 16  }
  0x26   : > { %2227 = dma.hbm_to_vmem [thread:$0]  (!%p2624_p5), %s235_s12, 4096, %s237_s14, %s2631_s17, %s2536_s9, %s2536_s9, %s2537_s10  }
  0x27   : > { %s2103_s11 = sshll.u32 %s2534_s24, 7  ;;  %s2976_s3 = sld [smem:[#allocation19_spill]] }
  0x28   : > { %s272_s7 = scalar_lea.vmem [#allocation9], %s1695_s16  ;;  %s2653_s27 = scalar_lea.sflag [#allocation10], %s224_s29 }
  0x29   : > { %s280_s18 = sshll.u32 %s272_s7, 4  ;;  %s281_s18 = int_to_ptr.vmem [resolvable:$true] %s280_s18 }
  0x2d   : > { %s277_s26 = scalar_lea.hbm %s2976_s3, %s2103_s11  ;;  %s2347_s9 = scalar_lea.hbm %s2976_s3, 256 }
  0x2e   : > { %s278_s19 = sshll.u32 %s277_s26, 4  ;;  %s279_s19 = int_to_ptr.hbm [resolvable:$true] %s278_s19 }
  0x2f   : > { %s2340_s8 = sshra.s32 %s279_s19, 4  ;;  %s2341_s8 = int_to_ptr.hbm [resolvable:$true] %s2340_s8 }
  0x30   : > { %s2342_s1 = scalar_lea.hbm %s2341_s8, 128  ;;  %p2348_p3 = scmp.lt.s32.totalorder %s2341_s8, %s2976_s3 }
  0x31   : > { %p2343_p0 = scmp.ne.s32.totalorder %s2341_s8, %s2342_s1  ;;  %p2349_p4 = scmp.lt.s32.totalorder %s2347_s9, %s2342_s1 }
  0x33   : > { %p2345_p1 = pnand %p2343_p0, %p2314_p7  ;;  %p2350_p6 = por %p2349_p4, %p2348_p3 }
  0x35   : > { %p2346_p2 = pneg %p2345_p1 }
  0x37   : > { %p2351_p8 = pnand %p2350_p6, %p2346_p2 }
  0x39   : > { %2354 = shalt.err (!%p2351_p8)
}
  0x3a   : > { %s2538_s29 = smov 128   ;;  %s2539_s11 = smov 8  }
  0x3b   : > { %2233 = dma.hbm_to_vmem [thread:$0]  (!%p2624_p5), %s279_s19, 2048, %s281_s18, %s2653_s27, %s2538_s29, %s2538_s29, %s2539_s11  }
  0x3c   : > { %s2668_s13 = sadd.s32 4294967295, %s2534_s24   ;;  %p65_p9 = scmp.ne.s32.totalorder %s2526_s22, %s2522_s21 }
  0x3d   : > { %p66_p10 = scmp.eq.s32.totalorder %s2668_s13, 0  ;;  %p1688_p11 = scmp.ge.s32.totalorder %s2534_s24, 1 }
  0x3e   : > { %p196_p12 = scmp.lt.s32.totalorder %s2534_s24, 3  ;;  %p1689_p0 = scmp.ne.s32.totalorder %s2668_s13, 0 }
  0x3f   : > { %p2677_p13 = por %p66_p10, %p65_p9  ;;  %s2979_s0 = sld [smem:[#allocation17_spill]] }
  0x40   : > { %p2682_p1 = pnand %p1688_p11, %p196_p12  ;;  %s2540_s21 = smov [#allocation3]  }
  0x41   : > { %s210_s19 = sshll.u32 %s2540_s21, 4  ;;  %s2201_s8 = smul.u32 384, %s2615_s30  ;;  %s211_s19 = int_to_ptr.vmem [resolvable:$true] %s210_s19 }
  0x42   : > { %p2220_p2 = pneg %p2682_p1  ;;  %s2202_s12 = smul.u32 384, %s2534_s24 }
  0x43   : > { %s250_s29 = scalar_lea.vmem [#allocation8], %s2201_s8  ;;  %s1698_s26 = sshll.u32 %s2615_s30, 5 }
  0x44   : > { %p2221_p3 = pnand %p2220_p2, %p66_p10  ;;  %s255_s16 = scalar_lea.hbm %s2966_s2, %s2202_s12 }
  0x45   : > { %s208_s18 = sshll.u32 %s2979_s0, 4  ;;  %s256_s10 = sshll.u32 %s255_s16, 4  ;;  %s209_s18 = int_to_ptr.hbm [resolvable:$true] %s208_s18  ;;  %s257_s10 = int_to_ptr.hbm [resolvable:$true] %s256_s10 }
  0x46   : > { %2223 = dma.hbm_to_vmem [thread:$0]  (!%p2221_p3), %s209_s18, 128, %s211_s19, [#allocation4]  }
  0x47   : > { %s258_s11 = sshll.u32 %s250_s29, 4  ;;  %s2400_s7 = sshra.s32 %s257_s10, 4  ;;  %s259_s11 = int_to_ptr.vmem [resolvable:$true] %s258_s11  ;;  %s2401_s7 = int_to_ptr.hbm [resolvable:$true] %s2400_s7 }
  0x48   : > { %s2402_s21 = scalar_lea.hbm %s2401_s7, 384  ;;  %s2407_s14 = scalar_lea.hbm %s2966_s2, 768 }
  0x49   : > { %p2403_p4 = scmp.ne.s32.totalorder %s2401_s7, %s2402_s21  ;;  %p2408_p9 = scmp.lt.s32.totalorder %s2401_s7, %s2966_s2 }
  0x4a   : > { %p2409_p11 = scmp.lt.s32.totalorder %s2407_s14, %s2402_s21 }
  0x4b   : > { %p2405_p6 = pnand %p2403_p4, %p2314_p7 }
  0x4c   : > { %p2410_p12 = por %p2409_p11, %p2408_p9 }
  0x4d   : > { %p2406_p8 = pneg %p2405_p6 }
  0x4f   : > { %p2411_p2 = pnand %p2410_p12, %p2406_p8 }
  0x51   : > { %2414 = shalt.err (!%p2411_p2)
}
  0x52   : > { %s2541_s30 = smov 64   ;;  %s2542_s19 = smov 4  }
  0x53   : > { %2230 = dma.hbm_to_vmem [thread:$0]  (!%p2624_p5), %s257_s10, 6144, %s259_s11, %s2631_s17, %s2541_s30, %s2541_s30, %s2542_s19  }
  0x54   : > { %s2104_s8 = sshll.u32 %s2534_s24, 5  ;;  %s294_s16 = scalar_lea.vmem [#allocation11], %s1698_s26 }
  0x55   : > { %s299_s3 = scalar_lea.hbm %s2968_s4, %s2104_s8  ;;  %s303_s29 = sshll.u32 %s294_s16, 4  ;;  %s304_s29 = int_to_ptr.vmem [resolvable:$true] %s303_s29 }
  0x56   : > { %s301_s7 = sshll.u32 %s299_s3, 4  ;;  %s2437_s24 = scalar_lea.hbm %s2968_s4, 64  ;;  %s302_s7 = int_to_ptr.hbm [resolvable:$true] %s301_s7 }
  0x57   : > { %s2430_s21 = sshra.s32 %s302_s7, 4  ;;  %s2431_s21 = int_to_ptr.hbm [resolvable:$true] %s2430_s21 }
  0x58   : > { %s2432_s14 = scalar_lea.hbm %s2431_s21, 32  ;;  %p2438_p8 = scmp.lt.s32.totalorder %s2431_s21, %s2968_s4 }
  0x59   : > { %p2433_p3 = scmp.ne.s32.totalorder %s2431_s21, %s2432_s14  ;;  %p2439_p9 = scmp.lt.s32.totalorder %s2437_s24, %s2432_s14 }
  0x5b   : > { %p2435_p4 = pnand %p2433_p3, %p2314_p7  ;;  %p2440_p11 = por %p2439_p9, %p2438_p8 }
  0x5d   : > { %p2436_p6 = pneg %p2435_p4 }
  0x5f   : > { %p2441_p12 = pnand %p2440_p11, %p2436_p6 }
  0x61   : > { %2444 = shalt.err (!%p2441_p12)
}
  0x62   : > { %2236 = dma.hbm_to_vmem [thread:$0]  (!%p2624_p5), %s302_s7, 512, %s304_s29, %s2653_s27  }
  0x63   : > { %312 = sbr.rel (%p2682_p1) target bundleno = 1921 (0x781), region = 44 }
  0x68   : > { %2505 = dma.done.wait (%p66_p10), [#allocation4], 128  }
  0x69   : > { %2507 = vsyncadd (%p66_p10), [#allocation4], 4294967168  ;;  %s319_s26 = sand.u32 1, %s2668_s13   ;;  %s321_s18 = sand.u32 1, %s2526_s22  }
  0x6a   : > { %s1703_s30 = sshll.u32 %s321_s18, 8  ;;  %s320_s19 = scalar_lea.sflag [#allocation7], %s319_s26 }
  0x6b   : > { %s2735_s8 = scalar_lea.vmem [#allocation6], %s1703_s30 }
  0x6c   : > { %2509 = dma.done.wait (%p2677_p13), %s320_s19, 10240  }
  0x6d   : > { %2511 = vsyncadd (%p2677_p13), %s320_s19, 4294957056  ;;  %s2203_s15 = smul.u32 384, %s321_s18  ;;  %s1704_s27 = sshll.u32 %s321_s18, 7 }
  0x6e   : > { %s340_s9 = scalar_lea.sflag [#allocation10], %s319_s26  ;;  %s2743_s0 = scalar_lea.vmem [#allocation9], %s1704_s27 }
  0x6f   : > { %s2741_s20 = scalar_lea.vmem [#allocation8], %s2203_s15 }
  0x70   : > { %2513 = dma.done.wait (%p2677_p13), %s340_s9, 2560  }
  0x71   : > { %2515 = vsyncadd (%p2677_p13), %s340_s9, 4294964736  ;;  %s1705_s3 = sshll.u32 %s321_s18, 5  ;;  %397 = sbr.rel (%p1689_p0) target bundleno = 120 (0x78), region = 68 }
  0x72   : > { %s2749_s16 = scalar_lea.vmem [#allocation11], %s1705_s3 }
  0x76   : > { %v398_v0 = vld [vmem:[#allocation3] sm:$0xff] }
  0x77   : > { %399 = vst [vmem:[#allocation2] sm:$0xff] %v398_v0 }
  0x78 PF: > { %v2543_v2 = vmov 128.0   ;;  %v1822_v3 = vld [vmem:[%s2735_s8 + $0xe0] sm:$0xf]  ;;  %v2135_v4 = vld [vmem:[%s2735_s8 + $0xec] sm:$0xf0]  ;;  %vm750_vm4 = vcmask 64512  }
  0x79   : > { %2283 = vrcp.f32 %v2543_v2  ;;  %v2133_v5 = vld [vmem:[%s2735_s8 + $0xe4] sm:$0xf]  ;;  %v1823_v6 = vor.u32 %v2135_v4, %v1822_v3  ;;  %v1824_v7 = vld [vmem:[%s2735_s8 + $0xf0] sm:$0xf0]  ;;  %v1830_v8 = vld [vmem:[%s2735_s8 + $0xe8] sm:$0xf] }
  0x7a   : > { %v2136_v9 = vld [vmem:[%s2735_s8 + $0xf4] sm:$0xf0]  ;;  %v1827_v10 = vor.u32 %v2133_v5, %v1824_v7  ;;  %v2134_v12 = vld [vmem:[%s2735_s8 + $0xec] sm:$0xf]  ;;  %v1832_v13 = vld [vmem:[%s2735_s8 + $0xf8] sm:$0xf0] }
  0x7b   : > { %v1831_v11 = vor.u32 %v2136_v9, %v1830_v8  ;;  %636 = vmatpush.bf16.msra.mxu0 %v1823_v6  ;;  %v1835_v14 = vor.u32 %v2134_v12, %v1832_v13  ;;  %v1806_v25 = vld [vmem:[%s2735_s8 + $0xc0] sm:$0xf]  ;;  %v2131_v26 = vld [vmem:[%s2735_s8 + $0xcc] sm:$0xf0]  ;;  %v2129_v27 = vld [vmem:[%s2735_s8 + $0xc4] sm:$0xf] }
  0x7c   : > { %649 = vmatpush.bf16.msra.mxu1 %v1827_v10  ;;  %v1807_v28 = vor.u32 %v2131_v26, %v1806_v25  ;;  %v1808_v29 = vld [vmem:[%s2735_s8 + $0xd0] sm:$0xf0]  ;;  %v1814_v30 = vld [vmem:[%s2735_s8 + $0xc8] sm:$0xf]  ;;  %v2132_v31 = vld [vmem:[%s2735_s8 + $0xd4] sm:$0xf0] }
  0x7d   : > { %662 = vmatpush.bf16.msra.mxu2 %v1831_v11  ;;  %675 = vmatpush.bf16.msra.mxu3 %v1835_v14  ;;  %v1811_v32 = vor.u32 %v2129_v27, %v1808_v29  ;;  %v1815_v33 = vor.u32 %v2132_v31, %v1814_v30  ;;  %v2130_v34 = vld [vmem:[%s2735_s8 + $0xcc] sm:$0xf]  ;;  %v1816_v35 = vld [vmem:[%s2735_s8 + $0xd8] sm:$0xf0]  ;;  %v1790_v37 = vld [vmem:[%s2735_s8 + $0xa0] sm:$0xf] }
  0x7e   : > { %v2753_v1 = vld [vmem:[#allocation2] sm:$0xff]  ;;  %v1819_v36 = vor.u32 %v2130_v34, %v1816_v35  ;;  %v2125_v39 = vld [vmem:[%s2735_s8 + $0xa4] sm:$0xf]  ;;  %v1798_v42 = vld [vmem:[%s2735_s8 + $0xa8] sm:$0xf]  ;;  %p2097_p5 = scmp.ne.s32.totalorder %s2668_s13, 1 }
  0x7f   : > { %403 = vadd.xlane.f32.xlu0 %v2753_v1  ;;  %v2284_v15 = vpop.eup %2283  ;;  %637 = vmatpush.bf16.msra.mxu0 %v1807_v28  ;;  %v2127_v38 = vld [vmem:[%s2735_s8 + $0xac] sm:$0xf0]  ;;  %v1792_v41 = vld [vmem:[%s2735_s8 + $0xb0] sm:$0xf0]  ;;  %v2128_v43 = vld [vmem:[%s2735_s8 + $0xb4] sm:$0xf0] }
  0x80   : > { %v406_v16 = vmul.f32 128.0, %v2284_v15  ;;  %vm410_vm0 = vweird.f32 %v2284_v15  ;;  %650 = vmatpush.bf16.msra.mxu1 %v1811_v32  ;;  %v1791_v40 = vor.u32 %v2127_v38, %v1790_v37  ;;  %v1795_v44 = vor.u32 %v2125_v39, %v1792_v41  ;;  %v2126_v46 = vld [vmem:[%s2735_s8 + $0xac] sm:$0xf]  ;;  %v1800_v47 = vld [vmem:[%s2735_s8 + $0xb8] sm:$0xf0] }
  0x81   : > { %663 = vmatpush.bf16.msra.mxu2 %v1815_v33  ;;  %676 = vmatpush.bf16.msra.mxu3 %v1819_v36  ;;  %v1799_v45 = vor.u32 %v2128_v43, %v1798_v42  ;;  %v1803_v48 = vor.u32 %v2126_v46, %v1800_v47  ;;  %v1774_v49 = vld [vmem:[%s2735_s8 + $0x80] sm:$0xf]  ;;  %v2123_v50 = vld [vmem:[%s2735_s8 + $0x8c] sm:$0xf0]  ;;  %v2121_v51 = vld [vmem:[%s2735_s8 + $0x84] sm:$0xf] }
  0x82   : > { %v407_v17 = vsub.f32 1.0, %v406_v16  ;;  %v1775_v52 = vor.u32 %v2123_v50, %v1774_v49  ;;  %v1776_v53 = vld [vmem:[%s2735_s8 + $0x90] sm:$0xf0]  ;;  %v1782_v54 = vld [vmem:[%s2735_s8 + $0x88] sm:$0xf] }
  0x83   : > { %638 = vmatpush.bf16.msra.mxu0 %v1791_v40  ;;  %v2124_v55 = vld [vmem:[%s2735_s8 + $0x94] sm:$0xf0]  ;;  %v1779_v56 = vor.u32 %v2121_v51, %v1776_v53  ;;  %v2122_v58 = vld [vmem:[%s2735_s8 + $0x8c] sm:$0xf]  ;;  %v1784_v59 = vld [vmem:[%s2735_s8 + $0x98] sm:$0xf0] }
  0x84   : > { %v408_v18 = vmul.f32 %v2284_v15, %v407_v17  ;;  %651 = vmatpush.bf16.msra.mxu1 %v1795_v44  ;;  %v1783_v57 = vor.u32 %v2124_v55, %v1782_v54  ;;  %v1787_v60 = vor.u32 %v2122_v58, %v1784_v59  ;;  %v1758_v61 = vld [vmem:[%s2735_s8 + $0x60] sm:$0xf]  ;;  %v2119_v62 = vld [vmem:[%s2735_s8 + $0x6c] sm:$0xf0]  ;;  %v2117_v63 = vld [vmem:[%s2735_s8 + $0x64] sm:$0xf] }
  0x85   : > { %664 = vmatpush.bf16.msra.mxu2 %v1799_v45  ;;  %677 = vmatpush.bf16.msra.mxu3 %v1803_v48  ;;  %v1759_v0 = vor.u32 %v2119_v62, %v1758_v61  ;;  %v1760_v2 = vld [vmem:[%s2735_s8 + $0x70] sm:$0xf0]  ;;  %v1766_v3 = vld [vmem:[%s2735_s8 + $0x68] sm:$0xf]  ;;  %v2120_v4 = vld [vmem:[%s2735_s8 + $0x74] sm:$0xf0] }
  0x86   : > { %v409_v19 = vadd.f32 %v2284_v15, %v408_v18  ;;  %v1763_v5 = vor.u32 %v2117_v63, %v1760_v2  ;;  %v1767_v6 = vor.u32 %v2120_v4, %v1766_v3  ;;  %v2118_v7 = vld [vmem:[%s2735_s8 + $0x6c] sm:$0xf]  ;;  %v1768_v8 = vld [vmem:[%s2735_s8 + $0x78] sm:$0xf0]  ;;  %v1742_v10 = vld [vmem:[%s2735_s8 + $0x40] sm:$0xf] }
  0x87   : > { %639 = vmatpush.bf16.msra.mxu0 %v1775_v52  ;;  %v1771_v9 = vor.u32 %v2118_v7, %v1768_v8  ;;  %v2115_v11 = vld [vmem:[%s2735_s8 + $0x4c] sm:$0xf0]  ;;  %v2113_v12 = vld [vmem:[%s2735_s8 + $0x44] sm:$0xf]  ;;  %v1744_v14 = vld [vmem:[%s2735_s8 + $0x50] sm:$0xf0] }
  0x88   : > { %v2764_v20 = vsel %vm410_vm0, %v2284_v15, %v409_v19  ;;  %652 = vmatpush.bf16.msra.mxu1 %v1779_v56  ;;  %v1743_v13 = vor.u32 %v2115_v11, %v1742_v10  ;;  %v1750_v15 = vld [vmem:[%s2735_s8 + $0x48] sm:$0xf]  ;;  %v2116_v16 = vld [vmem:[%s2735_s8 + $0x54] sm:$0xf0]  ;;  %v1747_v17 = vor.u32 %v2113_v12, %v1744_v14  ;;  %v2114_v19 = vld [vmem:[%s2735_s8 + $0x4c] sm:$0xf] }
  0x89   : > { %665 = vmatpush.bf16.msra.mxu2 %v1783_v57  ;;  %678 = vmatpush.bf16.msra.mxu3 %v1787_v60  ;;  %v1751_v18 = vor.u32 %v2116_v16, %v1750_v15  ;;  %v2111_v25 = vld [vmem:[%s2735_s8 + $0x2c] sm:$0xf0]  ;;  %v2109_v26 = vld [vmem:[%s2735_s8 + $0x24] sm:$0xf]  ;;  %v1728_v28 = vld [vmem:[%s2735_s8 + $0x30] sm:$0xf0] }
  0x8a   : > { %v1734_v29 = vld [vmem:[%s2735_s8 + $0x28] sm:$0xf]  ;;  %v2112_v30 = vld [vmem:[%s2735_s8 + $0x34] sm:$0xf0]  ;;  %v1731_v31 = vor.u32 %v2109_v26, %v1728_v28  ;;  %v2110_v33 = vld [vmem:[%s2735_s8 + $0x2c] sm:$0xf] }
  0x8b   : > { %640 = vmatpush.bf16.msra.mxu0 %v1759_v0  ;;  %v1735_v32 = vor.u32 %v2112_v30, %v1734_v29  ;;  %v1736_v34 = vld [vmem:[%s2735_s8 + $0x38] sm:$0xf0]  ;;  %v1710_v36 = vld [vmem:[%s2735_s8] sm:$0xf]  ;;  %v2107_v37 = vld [vmem:[%s2735_s8 + $0xc] sm:$0xf0] }
  0x8c   : > { %653 = vmatpush.bf16.msra.mxu1 %v1763_v5  ;;  %v1739_v35 = vor.u32 %v2110_v33, %v1736_v34  ;;  %v2105_v38 = vld [vmem:[%s2735_s8 + $0x4] sm:$0xf]  ;;  %v1711_v39 = vor.u32 %v2107_v37, %v1710_v36  ;;  %v1712_v40 = vld [vmem:[%s2735_s8 + $0x10] sm:$0xf0]  ;;  %v1718_v41 = vld [vmem:[%s2735_s8 + $0x8] sm:$0xf] }
  0x8d   : > { %666 = vmatpush.bf16.msra.mxu2 %v1767_v6  ;;  %679 = vmatpush.bf16.msra.mxu3 %v1771_v9  ;;  %v2108_v42 = vld [vmem:[%s2735_s8 + $0x14] sm:$0xf0]  ;;  %v1715_v43 = vor.u32 %v2105_v38, %v1712_v40  ;;  %v2106_v45 = vld [vmem:[%s2735_s8 + $0xc] sm:$0xf]  ;;  %v1720_v46 = vld [vmem:[%s2735_s8 + $0x18] sm:$0xf0] }
  0x8e   : > { %v1719_v44 = vor.u32 %v2108_v42, %v1718_v41  ;;  %v1723_v47 = vor.u32 %v2106_v45, %v1720_v46  ;;  %v401_v57 = vld [vmem:[%s2749_s16] ss:$0 sm:$0xff]  ;;  %v402_v60 = vld [vmem:[%s2749_s16 + $0x1] ss:$0 sm:$0xff] }
  0x8f   : > { %641 = vmatpush.bf16.msra.mxu0 %v1743_v13  ;;  %v1707_v0 = vld [vmem:[%s2749_s16 + $0x7] ss:$8 sm:$0xf] }
  0x90   : > { %654 = vmatpush.bf16.msra.mxu1 %v1747_v17  ;;  %v468_v2 = vperm.slane %v1707_v0, 0  ;;  %v470_v8 = vperm.slane %v1707_v0, 2  ;;  %v471_v9 = vperm.slane %v1707_v0, 3 }
  0x91   : > { %667 = vmatpush.bf16.msra.mxu2 %v1751_v18 }
  0x94   : > { %655 = vmatpush.bf16.msra.mxu1 %v1731_v31 }
  0x95   : > { %668 = vmatpush.bf16.msra.mxu2 %v1735_v32 }
  0x98   : > { %656 = vmatpush.bf16.msra.mxu1 %v1715_v43 }
  0x99   : > { %669 = vmatpush.bf16.msra.mxu2 %v1719_v44 }
  0xf2   : > { %v404_v21 = vpop.xlane.xlu0 %403 }
  0xf3   : > { %v412_v22 = vmul.f32 %v2764_v20, %v404_v21  ;;  %v1752_v21 = vld [vmem:[%s2735_s8 + $0x58] sm:$0xf0] }
  0xf5   : > { %v2768_v23 = vsub.f32 %v2753_v1, %v412_v22  ;;  %v1755_v22 = vor.u32 %v2114_v19, %v1752_v21 }
  0xf7   : > { %v414_v24 = vmul.f32 %v2768_v23, %v2768_v23  ;;  %680 = vmatpush.bf16.msra.mxu3 %v1755_v22 }
  0xf9   : > { %415 = vadd.xlane.f32.xlu0 %v414_v24  ;;  %v1726_v24 = vld [vmem:[%s2735_s8 + $0x20] sm:$0xf] }
  0xfa   : > { %v1727_v27 = vor.u32 %v2111_v25, %v1726_v24 }
  0xfb   : > { %681 = vmatpush.bf16.msra.mxu3 %v1739_v35 }
  0xfc   : > { %642 = vmatpush.bf16.msra.mxu0 %v1727_v27 }
  0xff   : > { %682 = vmatpush.bf16.msra.mxu3 %v1723_v47 }
 0x100   : > { %643 = vmatpush.bf16.msra.mxu0 %v1711_v39 }
 0x16c   : > { %v416_v48 = vpop.xlane.xlu0 %415 }
 0x16d   : > { %v417_v49 = vmul.f32 %v416_v48, %v2764_v20 }
 0x16f   : > { %v418_v50 = vadd.f32 1e-05, %v417_v49 }
 0x171   : > { %2285 = vrsqrt.f32 %v418_v50  ;;  %vm425_vm2 = vweird.f32 %v418_v50 }
 0x177   : > { %v2286_v51 = vpop.eup %2285 }
 0x178   : > { %v420_v52 = vmul.f32 %v2286_v51, %v418_v50  ;;  %vm426_vm1 = vweird.f32 %v2286_v51 }
 0x179   : > { %vm427_vm3 = vmor %vm425_vm2, %vm426_vm1 }
 0x17a   : > { %v421_v53 = vmul.f32 %v2286_v51, %v420_v52 }
 0x17c   : > { %v422_v54 = vmul.f32 0.5, %v421_v53 }
 0x17e   : > { %v423_v55 = vsub.f32 1.5, %v422_v54 }
 0x180   : > { %v424_v56 = vmul.f32 %v2286_v51, %v423_v55 }
 0x182   : > { %v428_v58 = vsel %vm427_vm3, %v2286_v51, %v424_v56 }
 0x183   : > { %v429_v59 = vmul.f32 %v428_v58, %v2768_v23  ;;  %v469_v23 = vperm.slane %v1707_v0, 1  ;;  %v2144_v58 = vld [vmem:[%s2741_s20 + $0x38] sm:$0xff] }
 0x184   : > { %v2168_v0 = vld [vmem:[%s2741_s20 + $0xf8] sm:$0xff] }
 0x185   : > { %v430_v61 = vmul.f32 %v429_v59, %v401_v57  ;;  %v2160_v59 = vld [vmem:[%s2741_s20 + $0xb8] sm:$0xff] }
 0x187   : > { %v431_v62 = vadd.f32 %v430_v61, %v402_v60  ;;  %v2143_v60 = vld [vmem:[%s2741_s20 + $0x30] sm:$0xff]  ;;  %v2152_v61 = vld [vmem:[%s2741_s20 + $0x78] sm:$0xff] }
 0x189   : > { %v432_v63 = vpack.c.bf16 %v431_v62, %v431_v62 }
 0x18b   : > { %644 = vmatmul.bf16.vlgmr.msra.gmra.mxu0 %v432_v63  ;;  %657 = vmatmul.bf16.vlgmr.msra.gmra.mxu1 %v432_v63 }
 0x18c   : > { %670 = vmatmul.bf16.vlgmr.msra.gmra.mxu2 %v432_v63  ;;  %683 = vmatmul.bf16.vlgmr.msra.gmra.mxu3 %v432_v63 }
 0x18d   : > { %697 = vmatpush.bf16.xpose.msrb.mxu0 %v432_v63  ;;  %714 = vmatpush.bf16.xpose.msrb.mxu1 %v432_v63 }
 0x18e   : > { %727 = vmatpush.bf16.xpose.msrb.mxu2 %v432_v63  ;;  %744 = vmatpush.bf16.xpose.msrb.mxu3 %v432_v63  ;;  %v2151_v63 = vld [vmem:[%s2741_s20 + $0x70] sm:$0xff] }
 0x195   : > { %813 = vmatpush.msra.mxu0 %v431_v62  ;;  %836 = vmatpush.msra.mxu1 %v431_v62 }
 0x196   : > { %859 = vmatpush.msra.mxu2 %v431_v62  ;;  %882 = vmatpush.msra.mxu3 %v431_v62  ;;  %v2159_v62 = vld [vmem:[%s2741_s20 + $0xb0] sm:$0xff] }
 0x208   : > { %v645_v3 = vpop.f32.mrf.mxu0  ;;  %v658_v4 = vpop.f32.mrf.mxu1 }
 0x209   : > { %v646_v5 = vadd.f32 %v645_v3, %v468_v2  ;;  %v659_v6 = vadd.f32 %v658_v4, %v469_v23  ;;  %v2142_v23 = vld [vmem:[%s2741_s20 + $0x28] sm:$0xff] }
 0x20a   : > { %v2158_v3 = vld [vmem:[%s2741_s20 + $0xa8] sm:$0xff] }
 0x20b   : > { %v688_v7 = vpack.c.bf16 %v659_v6, %v646_v5  ;;  %v2141_v5 = vld [vmem:[%s2741_s20 + $0x20] sm:$0xff] }
 0x20d   : > { %698 = vmatmul.bf16.vlgmr.msrb.gmra.mxu0 %v688_v7  ;;  %v704_v10 = vunpack.c.h.b16 %v688_v7  ;;  %v2140_v7 = vld [vmem:[%s2741_s20 + $0x18] sm:$0xff] }
 0x20e   : > { %1147 = vmatpush.bf16.msrb.mxu0 %v2144_v58 }
 0x20f   : > { %v671_v11 = vpop.f32.mrf.mxu2  ;;  %v684_v12 = vpop.f32.mrf.mxu3  ;;  %v705_v13 = vpack.c.b16 %v704_v10, %v704_v10 }
 0x210   : > { %v672_v14 = vadd.f32 %v671_v11, %v470_v8  ;;  %v685_v15 = vadd.f32 %v684_v12, %v471_v9  ;;  %v647_v16 = vpop.f32.mrf.mxu0  ;;  %v660_v17 = vpop.f32.mrf.mxu1  ;;  %v2139_v8 = vld [vmem:[%s2741_s20 + $0x10] sm:$0xff] }
 0x211   : > { %715 = vmatmul.bf16.vlgmr.msrb.gmra.mxu1 %v705_v13  ;;  %v2138_v13 = vld [vmem:[%s2741_s20 + $0x8] sm:$0xff] }
 0x212   : > { %v689_v18 = vpack.c.bf16 %v685_v15, %v672_v14  ;;  %1160 = vmatpush.bf16.msrb.mxu1 %v2152_v61  ;;  %1148 = vmatpush.bf16.msrb.mxu0 %v2143_v60  ;;  %v2027_v61 = vld [vmem:[%s2743_s0 + $0x70] sm:$0xf] }
 0x214   : > { %728 = vmatmul.bf16.vlgmr.msrb.gmra.mxu2 %v689_v18  ;;  %v734_v19 = vunpack.c.h.b16 %v689_v18  ;;  %v2137_v18 = vld [vmem:[%s2741_s20] sm:$0xff] }
 0x215   : > { %1173 = vmatpush.bf16.msrb.mxu2 %v2160_v59 }
 0x216   : > { %v735_v21 = vpack.c.b16 %v734_v19, %v734_v19  ;;  %1161 = vmatpush.bf16.msrb.mxu1 %v2151_v63  ;;  %1149 = vmatpush.bf16.msrb.mxu0 %v2142_v23  ;;  %v2150_v19 = vld [vmem:[%s2741_s20 + $0x68] sm:$0xff]  ;;  %v2183_v63 = vld [vmem:[%s2743_s0 + $0x74] sm:$0xf] }
 0x217   : > { %v673_v22 = vpop.f32.mrf.mxu2  ;;  %v686_v24 = vpop.f32.mrf.mxu3 }
 0x218   : > { %745 = vmatmul.bf16.vlgmr.msrb.gmra.mxu3 %v735_v21  ;;  %v2157_v21 = vld [vmem:[%s2741_s20 + $0xa0] sm:$0xff]  ;;  %v2167_v22 = vld [vmem:[%s2741_s20 + $0xf0] sm:$0xff] }
 0x219   : > { %1186 = vmatpush.bf16.msrb.mxu3 %v2168_v0  ;;  %1174 = vmatpush.bf16.msrb.mxu2 %v2159_v62  ;;  %v2149_v24 = vld [vmem:[%s2741_s20 + $0x60] sm:$0xff]  ;;  %v2184_v62 = vld [vmem:[%s2743_s0 + $0x74] sm:$0xf0] }
 0x21a   : > { %1150 = vmatpush.bf16.msrb.mxu0 %v2141_v5  ;;  %1162 = vmatpush.bf16.msrb.mxu1 %v2150_v19  ;;  %v2028_v0 = vor.u32 %v2184_v62, %v2027_v61  ;;  %v2178_v19 = vld [vmem:[%s2743_s0 + $0x44] sm:$0xf0]  ;;  %v2197_v61 = vld [vmem:[%s2741_s20 + $0x160] sm:$0xff] }
 0x21d   : > { %1175 = vmatpush.bf16.msrb.mxu2 %v2158_v3  ;;  %1187 = vmatpush.bf16.msrb.mxu3 %v2167_v22 }
 0x21e   : > { %1151 = vmatpush.bf16.msrb.mxu0 %v2140_v7  ;;  %1163 = vmatpush.bf16.msrb.mxu1 %v2149_v24  ;;  %v2182_v7 = vld [vmem:[%s2743_s0 + $0x64] sm:$0xf0]  ;;  %v2005_v24 = vld [vmem:[%s2743_s0 + $0x48] sm:$0xf0] }
 0x221   : > { %1176 = vmatpush.bf16.msrb.mxu2 %v2157_v21  ;;  %v2177_v21 = vld [vmem:[%s2743_s0 + $0x44] sm:$0xf] }
 0x222   : > { %1152 = vmatpush.bf16.msrb.mxu0 %v2139_v8  ;;  %v2181_v8 = vld [vmem:[%s2743_s0 + $0x64] sm:$0xf] }
 0x226   : > { %1153 = vmatpush.bf16.msrb.mxu0 %v2138_v13  ;;  %v2180_v13 = vld [vmem:[%s2743_s0 + $0x54] sm:$0xf0] }
 0x22a   : > { %1154 = vmatpush.bf16.msrb.mxu0 %v2137_v18  ;;  %v2003_v18 = vld [vmem:[%s2743_s0 + $0x40] sm:$0xf] }
 0x22b   : > { %v2004_v22 = vor.u32 %v2178_v19, %v2003_v18  ;;  %v1968_v18 = vld [vmem:[%s2749_s16 + $0x6] ss:$8 sm:$0x3] }
 0x22c   : > { %v1278_v19 = vperm.slane %v1968_v18, 0 }
 0x28a   : > { %v699_v25 = vpop.f32.mrf.mxu0 }
 0x28b   : > { %v751_v26 = vsel %vm750_vm4, %v699_v25, -inf }
 0x28c   : > { %752 = vmax.xlane.f32.xlu2 %v751_v26  ;;  %v2166_v26 = vld [vmem:[%s2741_s20 + $0xe8] sm:$0xff] }
 0x28d   : > { %1188 = vmatpush.bf16.msrb.mxu3 %v2166_v26  ;;  %v1995_v26 = vld [vmem:[%s2743_s0 + $0x30] sm:$0xf] }
 0x28e   : > { %v716_v27 = vpop.f32.mrf.mxu1 }
 0x28f   : > { %v754_v29 = vsel %vm750_vm4, %v716_v27, -inf }
 0x292   : > { %v701_v28 = vpop.f32.mrf.mxu0 }
 0x293   : > { %v2155_v28 = vld [vmem:[%s2741_s20 + $0x90] sm:$0xff] }
 0x294   : > { %755 = vmax.xlane.f32.xlu2 %v754_v29  ;;  %v2165_v29 = vld [vmem:[%s2741_s20 + $0xe0] sm:$0xff] }
 0x295   : > { %1189 = vmatpush.bf16.msrb.mxu3 %v2165_v29 }
 0x296   : > { %v718_v30 = vpop.f32.mrf.mxu1 }
 0x297   : > { %v729_v31 = vpop.f32.mrf.mxu2  ;;  %v2147_v30 = vld [vmem:[%s2741_s20 + $0x50] sm:$0xff] }
 0x298   : > { %v757_v32 = vsel %vm750_vm4, %v729_v31, -inf }
 0x299   : > { %758 = vmax.xlane.f32.xlu1 %v757_v32  ;;  %v2164_v32 = vld [vmem:[%s2741_s20 + $0xd8] sm:$0xff] }
 0x29a   : > { %1190 = vmatpush.bf16.msrb.mxu3 %v2164_v32  ;;  %v1987_v32 = vld [vmem:[%s2743_s0 + $0x20] sm:$0xf] }
 0x29b   : > { %v746_v33 = vpop.f32.mrf.mxu3 }
 0x29c   : > { %v760_v35 = vsel %vm750_vm4, %v746_v33, -inf }
 0x29f   : > { %v731_v34 = vpop.f32.mrf.mxu2 }
 0x2a0   : > { %v2153_v34 = vld [vmem:[%s2741_s20 + $0x80] sm:$0xff] }
 0x2a1   : > { %761 = vmax.xlane.f32.xlu1 %v760_v35  ;;  %v2163_v35 = vld [vmem:[%s2741_s20 + $0xd0] sm:$0xff] }
 0x2a2   : > { %1191 = vmatpush.bf16.msrb.mxu3 %v2163_v35 }
 0x2a3   : > { %v748_v36 = vpop.f32.mrf.mxu3 }
 0x2a4   : > { %v2145_v36 = vld [vmem:[%s2741_s20 + $0x40] sm:$0xff] }
 0x2ff   : > { %v753_v37 = vpop.xlane.xlu2 %752 }
 0x300   : > { %v763_v38 = vsub.f32 %v699_v25, %v753_v37  ;;  %v2156_v25 = vld [vmem:[%s2741_s20 + $0x98] sm:$0xff]  ;;  %v2162_v37 = vld [vmem:[%s2741_s20 + $0xc8] sm:$0xff] }
 0x301   : > { %1177 = vmatpush.bf16.msrb.mxu2 %v2156_v25  ;;  %1192 = vmatpush.bf16.msrb.mxu3 %v2162_v37  ;;  %v2008_v25 = vor.u32 %v2177_v21, %v2005_v24  ;;  %v1279_v21 = vperm.slane %v1968_v18, 1 }
 0x302   : > { %v767_v39 = vmul.f32 1.442695, %v763_v38  ;;  %v2161_v38 = vld [vmem:[%s2741_s20 + $0xc0] sm:$0xff] }
 0x304   : > { %2287 = vpow2.f32 %v767_v39 }
 0x305   : > { %1178 = vmatpush.bf16.msrb.mxu2 %v2155_v28  ;;  %1193 = vmatpush.bf16.msrb.mxu3 %v2161_v38  ;;  %v2175_v28 = vld [vmem:[%s2743_s0 + $0x34] sm:$0xf]  ;;  %v1979_v38 = vld [vmem:[%s2743_s0 + $0x10] sm:$0xf] }
 0x307   : > { %v756_v42 = vpop.xlane.xlu2 %755 }
 0x308   : > { %v764_v45 = vsub.f32 %v716_v27, %v756_v42  ;;  %v2148_v27 = vld [vmem:[%s2741_s20 + $0x58] sm:$0xff] }
 0x309   : > { %1164 = vmatpush.bf16.msrb.mxu1 %v2148_v27  ;;  %v2176_v27 = vld [vmem:[%s2743_s0 + $0x34] sm:$0xf0] }
 0x30a   : > { %v2288_v40 = vpop.eup %2287  ;;  %v769_v47 = vmul.f32 1.442695, %v764_v45  ;;  %v1996_v29 = vor.u32 %v2176_v27, %v1995_v26 }
 0x30b   : > { %v775_v41 = vsel %vm750_vm4, %v2288_v40, 0.0 }
 0x30c   : > { %v759_v43 = vpop.xlane.xlu1 %758  ;;  %776 = vadd.xlane.f32.xlu2 %v775_v41 }
 0x30d   : > { %v765_v44 = vsub.f32 %v729_v31, %v759_v43  ;;  %v2154_v31 = vld [vmem:[%s2741_s20 + $0x88] sm:$0xff]  ;;  %1165 = vmatpush.bf16.msrb.mxu1 %v2147_v30  ;;  %v1997_v30 = vld [vmem:[%s2743_s0 + $0x38] sm:$0xf0] }
 0x30e   : > { %1179 = vmatpush.bf16.msrb.mxu2 %v2154_v31  ;;  %v2000_v31 = vor.u32 %v2175_v28, %v1997_v30 }
 0x30f   : > { %v771_v46 = vmul.f32 1.442695, %v765_v44 }
 0x311   : > { %2289 = vpow2.f32 %v771_v46 }
 0x312   : > { %2291 = vpow2.f32 %v769_v47  ;;  %1180 = vmatpush.bf16.msrb.mxu2 %v2153_v34  ;;  %v2173_v34 = vld [vmem:[%s2743_s0 + $0x24] sm:$0xf] }
 0x314   : > { %v762_v48 = vpop.xlane.xlu1 %761 }
 0x315   : > { %v766_v49 = vsub.f32 %v746_v33, %v762_v48  ;;  %v2146_v33 = vld [vmem:[%s2741_s20 + $0x48] sm:$0xff] }
 0x316   : > { %1166 = vmatpush.bf16.msrb.mxu1 %v2146_v33  ;;  %v2174_v33 = vld [vmem:[%s2743_s0 + $0x24] sm:$0xf0] }
 0x317   : > { %v2290_v50 = vpop.eup %2289  ;;  %v773_v51 = vmul.f32 1.442695, %v766_v49  ;;  %v1988_v35 = vor.u32 %v2174_v33, %v1987_v32  ;;  %v1392_v32 = vld [vmem:[%s2749_s16 + $0x5] ss:$0 sm:$0xff] }
 0x318   : > { %v781_v52 = vsel %vm750_vm4, %v2290_v50, 0.0  ;;  %v2292_v53 = vpop.eup %2291 }
 0x319   : > { %2293 = vpow2.f32 %v773_v51  ;;  %782 = vadd.xlane.f32.xlu0 %v781_v52  ;;  %v778_v56 = vsel %vm750_vm4, %v2292_v53, 0.0 }
 0x31a   : > { %1167 = vmatpush.bf16.msrb.mxu1 %v2145_v36  ;;  %v1989_v36 = vld [vmem:[%s2743_s0 + $0x28] sm:$0xf0] }
 0x31b   : > { %v1992_v37 = vor.u32 %v2173_v34, %v1989_v36 }
 0x31f   : > { %v2294_v54 = vpop.eup %2293 }
 0x320   : > { %v784_v55 = vsel %vm750_vm4, %v2294_v54, 0.0 }
 0x321   : > { %785 = vadd.xlane.f32.xlu1 %v784_v55  ;;  %779 = vadd.xlane.f32.xlu0 %v778_v56 }
 0x37f   : > { %v777_v57 = vpop.xlane.xlu2 %776 }
 0x380   : > { %2295 = vrcp.f32 %v777_v57  ;;  %v1200_v57 = vld [vmem:[%s2749_s16 + $0x4] ss:$0 sm:$0xff] }
 0x386   : > { %v2296_v2 = vpop.eup %2295 }
 0x387   : > { %v791_v4 = vmul.f32 %v2296_v2, %v2288_v40  ;;  %v2029_v2 = vld [vmem:[%s2743_s0 + $0x78] sm:$0xf0] }
 0x388   : > { %v2032_v23 = vor.u32 %v2183_v63, %v2029_v2  ;;  %v2188_v63 = vld [vmem:[%s2741_s20 + $0x118] sm:$0xff] }
 0x389   : > { %1836 = vmatmul.msk.f32.vlgmr.msra.gmra.mxu0 %vm750_vm4, %v791_v4 }
 0x38a   : > { %1362 = vmatpush.bf16.msra.mxu0 %v2028_v0  ;;  %v2196_v0 = vld [vmem:[%s2741_s20 + $0x158] sm:$0xff] }
 0x38c   : > { %v783_v6 = vpop.xlane.xlu0 %782 }
 0x38d   : > { %2297 = vrcp.f32 %v783_v6  ;;  %v2019_v6 = vld [vmem:[%s2743_s0 + $0x60] sm:$0xf] }
 0x393   : > { %v2298_v9 = vpop.eup %2297 }
 0x394   : > { %v793_v10 = vmul.f32 %v2298_v9, %v2290_v50  ;;  %v786_v11 = vpop.xlane.xlu1 %785  ;;  %v780_v12 = vpop.xlane.xlu0 %779  ;;  %v2020_v9 = vor.u32 %v2182_v7, %v2019_v6 }
 0x395   : > { %2299 = vrcp.f32 %v786_v11 }
 0x396   : > { %2301 = vrcp.f32 %v780_v12  ;;  %1838 = vmatmul.msk.f32.vlgmr.msra.gmra.mxu2 %vm750_vm4, %v793_v10  ;;  %v2021_v10 = vld [vmem:[%s2743_s0 + $0x68] sm:$0xf0]  ;;  %1363 = vmatpush.bf16.msra.mxu0 %v2020_v9  ;;  %v2011_v12 = vld [vmem:[%s2743_s0 + $0x50] sm:$0xf] }
 0x397   : > { %v2024_v11 = vor.u32 %v2181_v8, %v2021_v10  ;;  %v1202_v8 = vld [vmem:[%s2749_s16 + $0x2] ss:$0 sm:$0xff]  ;;  %v1203_v10 = vld [vmem:[%s2749_s16 + $0x3] ss:$0 sm:$0xff] }
 0x39b   : > { %v2300_v14 = vpop.eup %2299 }
 0x39c   : > { %v2302_v15 = vpop.eup %2301  ;;  %v794_v16 = vmul.f32 %v2300_v14, %v2294_v54  ;;  %v2179_v14 = vld [vmem:[%s2743_s0 + $0x54] sm:$0xf] }
 0x39d   : > { %v792_v17 = vmul.f32 %v2302_v15, %v2292_v53  ;;  %v2012_v15 = vor.u32 %v2180_v13, %v2011_v12 }
 0x39e   : > { %1839 = vmatmul.msk.f32.vlgmr.msra.gmra.mxu3 %vm750_vm4, %v794_v16  ;;  %v2013_v16 = vld [vmem:[%s2743_s0 + $0x58] sm:$0xf0] }
 0x39f   : > { %1837 = vmatmul.msk.f32.vlgmr.msra.gmra.mxu1 %vm750_vm4, %v792_v17  ;;  %v2016_v17 = vor.u32 %v2179_v14, %v2013_v16  ;;  %1364 = vmatpush.bf16.msra.mxu0 %v2012_v15  ;;  %v2186_v14 = vld [vmem:[%s2741_s20 + $0x108] sm:$0xff]  ;;  %v2185_v16 = vld [vmem:[%s2741_s20 + $0x100] sm:$0xff] }
 0x3a0   : > { %1375 = vmatpush.bf16.msra.mxu1 %v2032_v23  ;;  %v2194_v15 = vld [vmem:[%s2741_s20 + $0x148] sm:$0xff] }
 0x3a3   : > { %1365 = vmatpush.bf16.msra.mxu0 %v2004_v22 }
 0x3a4   : > { %1376 = vmatpush.bf16.msra.mxu1 %v2024_v11 }
 0x3a7   : > { %1366 = vmatpush.bf16.msra.mxu0 %v1996_v29 }
 0x3a8   : > { %1377 = vmatpush.bf16.msra.mxu1 %v2016_v17  ;;  %v2193_v17 = vld [vmem:[%s2741_s20 + $0x140] sm:$0xff] }
 0x3ab   : > { %1367 = vmatpush.bf16.msra.mxu0 %v1988_v35 }
 0x3ac   : > { %1378 = vmatpush.bf16.msra.mxu1 %v2008_v25 }
 0x3b0   : > { %1379 = vmatpush.bf16.msra.mxu1 %v2000_v31 }
 0x3b4   : > { %1380 = vmatpush.bf16.msra.mxu1 %v1992_v37 }
 0x406   : > { %v815_v39 = vpop.f32.mrf.mxu0 }
 0x407   : > { %v887_v40 = vpack.c.bf16 %v815_v39, %v815_v39  ;;  %v2172_v39 = vld [vmem:[%s2743_s0 + $0x14] sm:$0xf0] }
 0x409   : > { %1155 = vmatmul.bf16.vlgmr.msrb.gmra.mxu0 %v887_v40  ;;  %v2171_v40 = vld [vmem:[%s2743_s0 + $0x14] sm:$0xf] }
 0x419   : > { %v861_v41 = vpop.f32.mrf.mxu2 }
 0x41a   : > { %v889_v42 = vpack.c.bf16 %v861_v41, %v861_v41  ;;  %v1980_v41 = vor.u32 %v2172_v39, %v1979_v38 }
 0x41c   : > { %v838_v43 = vpop.f32.mrf.mxu1  ;;  %1181 = vmatmul.bf16.vlgmr.msrb.gmra.mxu2 %v889_v42  ;;  %v1981_v42 = vld [vmem:[%s2743_s0 + $0x18] sm:$0xf0]  ;;  %1368 = vmatpush.bf16.msra.mxu0 %v1980_v41 }
 0x41d   : > { %v888_v44 = vpack.c.bf16 %v838_v43, %v838_v43  ;;  %v1971_v43 = vld [vmem:[%s2743_s0] sm:$0xf] }
 0x41f   : > { %1168 = vmatmul.bf16.vlgmr.msrb.gmra.mxu1 %v888_v44  ;;  %v2170_v44 = vld [vmem:[%s2743_s0 + $0x4] sm:$0xf0] }
 0x421   : > { %v884_v45 = vpop.f32.mrf.mxu3 }
 0x422   : > { %v890_v46 = vpack.c.bf16 %v884_v45, %v884_v45  ;;  %v1984_v45 = vor.u32 %v2171_v40, %v1981_v42 }
 0x424   : > { %1194 = vmatmul.bf16.vlgmr.msrb.gmra.mxu3 %v890_v46  ;;  %v2169_v46 = vld [vmem:[%s2743_s0 + $0x4] sm:$0xf]  ;;  %1381 = vmatpush.bf16.msra.mxu1 %v1984_v45 }
 0x486   : > { %v1156_v47 = vpop.f32.mrf.mxu0 }
 0x48e   : > { %v1158_v48 = vpop.f32.mrf.mxu0 }
 0x48f   : > { %v1972_v48 = vor.u32 %v2170_v44, %v1971_v43 }
 0x491   : > { %1369 = vmatpush.bf16.msra.mxu0 %v1972_v48 }
 0x49c   : > { %v1169_v49 = vpop.f32.mrf.mxu1 }
 0x49d   : > { %v1170_v51 = vadd.f32 %v1169_v49, %v1156_v47  ;;  %v1973_v47 = vld [vmem:[%s2743_s0 + $0x8] sm:$0xf0] }
 0x49e   : > { %v1976_v49 = vor.u32 %v2169_v46, %v1973_v47 }
 0x49f   : > { %v1182_v50 = vpop.f32.mrf.mxu2 }
 0x4a0   : > { %v1183_v53 = vadd.f32 %v1182_v50, %v1170_v51  ;;  %v2192_v50 = vld [vmem:[%s2741_s20 + $0x138] sm:$0xff]  ;;  %1382 = vmatpush.bf16.msra.mxu1 %v1976_v49 }
 0x4a1   : > { %v2200_v51 = vld [vmem:[%s2741_s20 + $0x178] sm:$0xff]  ;;  %1489 = vmatpush.bf16.msra.mxu2 %v2192_v50 }
 0x4a2   : > { %1502 = vmatpush.bf16.msra.mxu3 %v2200_v51 }
 0x4a4   : > { %v1171_v52 = vpop.f32.mrf.mxu1 }
 0x4a7   : > { %v1184_v54 = vpop.f32.mrf.mxu2  ;;  %v1195_v55 = vpop.f32.mrf.mxu3 }
 0x4a8   : > { %v1196_v56 = vadd.f32 %v1195_v55, %v1183_v53  ;;  %v2191_v54 = vld [vmem:[%s2741_s20 + $0x130] sm:$0xff] }
 0x4a9   : > { %v2199_v55 = vld [vmem:[%s2741_s20 + $0x170] sm:$0xff]  ;;  %1490 = vmatpush.bf16.msra.mxu2 %v2191_v54 }
 0x4aa   : > { %v1199_v58 = vadd.f32 %v1196_v56, %v2753_v1  ;;  %1503 = vmatpush.bf16.msra.mxu3 %v2199_v55 }
 0x4ac   : > { %v2879_v59 = vadd.f32 %v1200_v57, %v1199_v58  ;;  %v2190_v57 = vld [vmem:[%s2741_s20 + $0x128] sm:$0xff] }
 0x4ad   : > { %v2198_v58 = vld [vmem:[%s2741_s20 + $0x168] sm:$0xff]  ;;  %1491 = vmatpush.bf16.msra.mxu2 %v2190_v57 }
 0x4ae   : > { %1204 = vadd.xlane.f32.xlu1 %v2879_v59  ;;  %1504 = vmatpush.bf16.msra.mxu3 %v2198_v58 }
 0x4af   : > { %v1197_v60 = vpop.f32.mrf.mxu3 }
 0x4b0   : > { %v2189_v60 = vld [vmem:[%s2741_s20 + $0x120] sm:$0xff] }
 0x4b1   : > { %1492 = vmatpush.bf16.msra.mxu2 %v2189_v60 }
 0x4b2   : > { %1505 = vmatpush.bf16.msra.mxu3 %v2197_v61 }
 0x4b5   : > { %1493 = vmatpush.bf16.msra.mxu2 %v2188_v63 }
 0x4b6   : > { %1506 = vmatpush.bf16.msra.mxu3 %v2196_v0 }
 0x521   : > { %v1205_v1 = vpop.xlane.xlu1 %1204 }
 0x522   : > { %v1206_v3 = vmul.f32 %v1205_v1, %v2764_v20  ;;  %v2187_v1 = vld [vmem:[%s2741_s20 + $0x110] sm:$0xff] }
 0x523   : > { %1494 = vmatpush.bf16.msra.mxu2 %v2187_v1 }
 0x524   : > { %v2888_v4 = vsub.f32 %v2879_v59, %v1206_v3  ;;  %v2195_v3 = vld [vmem:[%s2741_s20 + $0x150] sm:$0xff] }
 0x525   : > { %1507 = vmatpush.bf16.msra.mxu3 %v2195_v3 }
 0x526   : > { %v1208_v5 = vmul.f32 %v2888_v4, %v2888_v4 }
 0x527   : > { %1495 = vmatpush.bf16.msra.mxu2 %v2186_v14 }
 0x528   : > { %1209 = vadd.xlane.f32.xlu2 %v1208_v5 }
 0x529   : > { %1508 = vmatpush.bf16.msra.mxu3 %v2194_v15 }
 0x52b   : > { %1496 = vmatpush.bf16.msra.mxu2 %v2185_v16 }
 0x52d   : > { %1509 = vmatpush.bf16.msra.mxu3 %v2193_v17 }
 0x59b   : > { %v1210_v52 = vpop.xlane.xlu2 %1209 }
 0x59c   : > { %v1211_v53 = vmul.f32 %v1210_v52, %v2764_v20 }
 0x59e   : > { %v1212_v56 = vadd.f32 1e-05, %v1211_v53 }
 0x5a0   : > { %2303 = vrsqrt.f32 %v1212_v56  ;;  %vm1219_vm6 = vweird.f32 %v1212_v56 }
 0x5a6   : > { %v2304_v62 = vpop.eup %2303 }
 0x5a7   : > { %v1214_v20 = vmul.f32 %v2304_v62, %v1212_v56  ;;  %vm1220_vm5 = vweird.f32 %v2304_v62 }
 0x5a8   : > { %vm1221_vm7 = vmor %vm1219_vm6, %vm1220_vm5 }
 0x5a9   : > { %v1215_v2 = vmul.f32 %v2304_v62, %v1214_v20 }
 0x5ab   : > { %v1216_v23 = vmul.f32 0.5, %v1215_v2 }
 0x5ad   : > { %v1217_v5 = vsub.f32 1.5, %v1216_v23 }
 0x5af   : > { %v1218_v6 = vmul.f32 %v2304_v62, %v1217_v5 }
 0x5b1   : > { %v1222_v7 = vsel %vm1221_vm7, %v2304_v62, %v1218_v6 }
 0x5b2   : > { %v1223_v9 = vmul.f32 %v1222_v7, %v2888_v4 }
 0x5b4   : > { %v1224_v11 = vmul.f32 %v1223_v9, %v1202_v8 }
 0x5b6   : > { %v1225_v12 = vadd.f32 %v1224_v11, %v1203_v10 }
 0x5b8   : > { %v1274_v13 = vpack.c.bf16 %v1225_v12, %v1225_v12 }
 0x5ba   : > { %1370 = vmatmul.bf16.vlgmr.msra.gmra.mxu0 %v1274_v13  ;;  %1383 = vmatmul.bf16.vlgmr.msra.gmra.mxu1 %v1274_v13 }
 0x637   : > { %v1371_v22 = vpop.f32.mrf.mxu0  ;;  %v1384_v4 = vpop.f32.mrf.mxu1 }
 0x638   : > { %v1372_v24 = vadd.f32 %v1371_v22, %v1278_v19  ;;  %v1385_v25 = vadd.f32 %v1384_v4, %v1279_v21 }
 0x63a   : > { %v1388_v26 = vmax.f32 %v1372_v24, 0.0  ;;  %v1389_v27 = vmax.f32 %v1385_v25, 0.0 }
 0x63c   : > { %v1390_v28 = vpack.c.bf16 %v1388_v26, %v1388_v26  ;;  %v1391_v29 = vpack.c.bf16 %v1389_v27, %v1389_v27 }
 0x63e   : > { %1497 = vmatmul.bf16.vlgmr.msra.gmra.mxu2 %v1390_v28  ;;  %1510 = vmatmul.bf16.vlgmr.msra.gmra.mxu3 %v1391_v29 }
 0x63f   : > { %v1373_v30 = vpop.f32.mrf.mxu0  ;;  %v1386_v31 = vpop.f32.mrf.mxu1 }
 0x6c1   : > { %v1498_v33 = vpop.f32.mrf.mxu2  ;;  %v1511_v34 = vpop.f32.mrf.mxu3 }
 0x6c2   : > { %v1499_v35 = vadd.f32 %v1498_v33, %v1392_v32 }
 0x6c4   : > { %v1512_v36 = vadd.f32 %v1511_v34, %v1499_v35 }
 0x6c5   : > { %1520 = sbr.rel (%p2097_p5) target bundleno = 1916 (0x77c), region = 72 }
 0x6c6   : > { %v1515_v37 = vadd.f32 %v1512_v36, %v2879_v59 }
 0x6c8   : > { %1516 = vst [vmem:[#allocation2] sm:$0xff] %v1515_v37 }
 0x6c9   : > { %v1500_v38 = vpop.f32.mrf.mxu2  ;;  %v1513_v39 = vpop.f32.mrf.mxu3 }
 0x6ca   : > { %v2305_v40 = vld [vmem:[%s2969_s5] ss:$0 sm:$0xff] }
 0x6cb   : > { %v1525_v41 = vmul.f32 %v2305_v40, %v1515_v37 }
 0x6cd   : > { %1526 = vadd.xlane.f32.xlu0 %v1525_v41 }
 0x740   : > { %v1527_v42 = vpop.xlane.xlu0 %1526 }
 0x741   : > { %v1528_v43 = vrot.slane %v1527_v42, 4 }
 0x743   : > { %v1529_v44 = vmax.f32 %v1527_v42, %v1528_v43 }
 0x745   : > { %v1530_v45 = vrot.slane %v1529_v44, 2 }
 0x747   : > { %v1531_v46 = vmax.f32 %v1529_v44, %v1530_v45 }
 0x749   : > { %v1532_v47 = vrot.slane %v1531_v46, 1 }
 0x74b   : > { %v1533_v48 = vmax.f32 %v1531_v46, %v1532_v47 }
 0x74d   : > { %v1534_v59 = vsub.f32 %v1527_v42, %v1533_v48 }
 0x74f   : > { %v1535_v49 = vmul.f32 1.442695, %v1534_v59 }
 0x751   : > { %2306 = vpow2.f32 %v1535_v49 }
 0x757   : > { %v2307_v50 = vpop.eup %2306 }
 0x758   : > { %v1537_v51 = vrot.slane %v2307_v50, 4 }
 0x75a   : > { %v1538_v52 = vadd.f32 %v2307_v50, %v1537_v51 }
 0x75c   : > { %v1539_v53 = vrot.slane %v1538_v52, 2 }
 0x75e   : > { %v1540_v54 = vadd.f32 %v1539_v53, %v1538_v52 }
 0x760   : > { %v1541_v55 = vrot.slane %v1540_v54, 1 }
 0x762   : > { %v1542_v56 = vadd.f32 %v1541_v55, %v1540_v54 }
 0x764   : > { %2308 = vrcp.f32 %v1542_v56 }
 0x76a   : > { %v2309_v57 = vpop.eup %2308 }
 0x76b   : > { %v1544_v58 = vmul.f32 %v2309_v57, %v2307_v50 }
 0x76d   : > { %v1545_v60 = vmul.f32 %v1544_v58, %v1515_v37 }
 0x76f   : > { %v1546_v61 = vrot.slane %v1545_v60, 4 }
 0x771   : > { %v1547_v62 = vadd.f32 %v1546_v61, %v1545_v60 }
 0x773   : > { %v1548_v20 = vrot.slane %v1547_v62, 2 }
 0x775   : > { %v1549_v63 = vadd.f32 %v1548_v20, %v1547_v62 }
 0x777   : > { %v1550_v0 = vrot.slane %v1549_v63, 1 }
 0x779   : > { %v1551_v2 = vadd.f32 %v1550_v0, %v1549_v63 }
 0x77b   : > { %1552 = vst [vmem:[#allocation12] sm:$0x1] %v1551_v2 }
 0x77c PF: > { %p2240_p7 = scmp.eq.s32.totalorder %s2668_s13, 1  ;;  %s2544_s7 = smov [#allocation12]  }
 0x77d   : > { %s1559_s21 = sshll.u32 %s2544_s7, 4  ;;  %s1561_s17 = sshll.u32 %s2970_s6, 4  ;;  %s1560_s21 = int_to_ptr.vmem [resolvable:$true] %s1559_s21  ;;  %s1562_s17 = int_to_ptr.hbm [resolvable:$true] %s1561_s17 }
 0x77e   : > { %2217 = dma.vmem_to_hbm [thread:$0]  (%p2240_p7), %s1560_s21, 16, %s1562_s17, [#allocation5]  }
 0x77f   : > { %2517 = dma.done.wait (%p2240_p7), [#allocation5], 16  }
 0x780   : > { %2519 = vsyncadd (%p2240_p7), [#allocation5], 4294967280 }
 0x781 PF: > { %p21_p10 = scmp.ge.s32.totalorder %s2601_s25, 4   ;;  %s2980_s21 = smov %s2526_s22 }
 0x782   : > { %s2981_s22 = smov %s2530_s23  ;;  %s2982_s23 = smov %s2611_s28 }
 0x783   : > { %s2983_s24 = smov %s2601_s25  ;;  %23 = sbr.rel (!%p21_p10) target bundleno = 11 (0xb), region = 131 }
 0x788   :  { %1575 = vsyncpa [#allocation4], 1 }
 0x789   :  { %1577 = vsyncpa [#allocation4 + $0x1], 1 }
 0x78a   :  { %1578 = vsyncpa [#allocation7], 1 }
 0x78b   :  { %1580 = vsyncpa [#allocation7 + $0x1], 1 }
 0x78c   :  { %1581 = vsyncpa [#allocation10], 1 }
 0x78d   :  { %1583 = vsyncpa [#allocation10 + $0x1], 1 }
 0x78e   :  { %1584 = vsyncpa [#allocation5], 1 }
 0x78f   :  { %1586 = vsyncpa [#allocation5 + $0x1], 1 }

</bundles_post_ra>
